<compile_context>
chip_gen: v5e
topology: v5e:2x2
jax: 0.10.0
libtpu: 0.0.40
codegen_flags: <defaults>
</compile_context>

<pallas_src>
import functools

import jax
import jax.numpy as jnp
from jax import lax
from jax.experimental import pallas as pl
from jax.experimental.pallas import tpu as pltpu


# ----------------------------------------------------------------------------
# Hardware-introspection helpers (safe fallbacks everywhere).
# ----------------------------------------------------------------------------
def _device_kind() -> str:
    try:
        return jax.devices()[0].device_kind.lower()
    except Exception:
        return ""


def _bf16_elementwise_ok() -> bool:
    """bf16 EUP/VPU only on v6e / v7x (NOT v5e)."""
    kind = _device_kind()
    return ("v6" in kind) or ("v7" in kind)


def _vmem_limit_bytes() -> int:
    """~75% of physical VMEM: 48 MiB on v7x (64 MiB parts), 96 MiB on 128 MiB parts."""
    cap = None
    try:
        cap = getattr(pltpu.get_tpu_info(), "vmem_capacity_bytes", None)
    except Exception:
        cap = None
    if not cap:
        cap = (64 if "v7" in _device_kind() else 128) * 1024 * 1024
    return int(cap) * 3 // 4


def _largest_divisor_leq(n: int, target: int) -> int:
    target = max(1, min(n, target))
    for c in range(target, 0, -1):
        if n % c == 0:
            return c
    return 1


def _pick_tile(s: int, target: int) -> int:
    """Largest divisor of s that is <= target and a multiple of 8 (else s itself)."""
    if s <= target:
        return s
    for c in range(min(s, target), 7, -1):
        if s % c == 0 and c % 8 == 0:
            return c
    return s


# ----------------------------------------------------------------------------
# One-time host-side weight preparation (call once, cache the result).
# ----------------------------------------------------------------------------
def prepare_mha_params(w_qkv, w_out, *, n_head, compute_dtype=jnp.bfloat16,
                       group_size=None):
    """Re-layout PyTorch Linear weights for the kernel.

    w_qkv: (3*D, D)  PyTorch Linear layout (out_features, in_features)
    w_out: (D, D)    PyTorch Linear layout
    Returns a params dict; do NOT rebuild it on every forward call.
    """
    D3, D = w_qkv.shape
    assert D3 == 3 * D and D % n_head == 0
    d_h = D // n_head
    cdt = jnp.dtype(compute_dtype)

    # Heads per grid step: aim for g*d_h ~= 256 (MXU N/K fill on v6e/v7x).
    g = group_size if group_size is not None else _largest_divisor_leq(
        n_head, max(1, 256 // d_h))
    assert n_head % g == 0
    G = n_head // g

    # qkv = x @ w_qkv.T reshaped (B,S,3,H,d_h) => columns ordered (3, H, d_h).
    wqkv_t = w_qkv.T.reshape(D, 3, n_head, d_h)          # (D, 3, H, d_h)

    def group(a):                                        # (D, H, d_h) -> (G, D, g*d_h)
        return jnp.transpose(a.reshape(D, G, g * d_h), (1, 0, 2))

    scale = 1.0 / (d_h ** 0.5)
    w_q = (group(wqkv_t[:, 0]) * scale).astype(cdt)      # scale folded into W_q
    w_k = group(wqkv_t[:, 1]).astype(cdt)
    w_v = group(wqkv_t[:, 2]).astype(cdt)
    # out = concat_h(o_h) @ w_out.T  =>  sum over head groups of o_grp @ W_o[grp]
    w_o = w_out.T.reshape(G, g * d_h, D).astype(cdt)     # (G, g*d_h, D)

    return dict(w_q=w_q, w_k=w_k, w_v=w_v, w_o=w_o,
                n_head=n_head, d_h=d_h, group_size=g, compute_dtype=cdt)


# ----------------------------------------------------------------------------
# Kernel: grid = (batch, q_tile, head_group, kv_tile)
# ----------------------------------------------------------------------------
def _mha_flash_kernel(x_q_ref, x_kv_ref, wq_ref, wk_ref, wv_ref, wo_ref,
                      o_ref,
                      acc_ref, q_scr, o_scr, m_scr, l_scr,
                      *, g, d_h, compute_dtype, exp_dtype, approx_recip):
    """One grid step == (batch b, query tile qt, head group hg, kv tile kv).

    x_q_ref:  (1, tq, D)       query rows (resident across hg, kv)
    x_kv_ref: (1, tkv, D)      key/value rows for this kv tile
    wq_ref:   (1, D, g*d_h)    this group's (pre-scaled) Q weights
    wk_ref:   (1, D, g*d_h)    this group's K weights
    wv_ref:   (1, D, g*d_h)    this group's V weights
    wo_ref:   (1, g*d_h, D)    this group's slice of W_out^T
    o_ref:    (1, tq, D)       output tile (written on last hg & kv)
    acc_ref:  (tq, D) f32      output-projection accumulator over head groups
    q_scr:    (tq, g*d_h) cdt  Q projection for this head group
    o_scr:    (tq, g*d_h) f32  unnormalized per-head PV accumulators
    m_scr:    (g, tq, 1) f32   running row maxima (online softmax)
    l_scr:    (g, tq, 1) f32   running denominators (online softmax)
    """
    hg = pl.program_id(2)
    kv = pl.program_id(3)
    n_hg = pl.num_programs(2)
    n_kv = pl.num_programs(3)
    cdt = compute_dtype

    @pl.when((hg == 0) & (kv == 0))
    def _init_acc():
        acc_ref[...] = jnp.zeros_like(acc_ref)

    @pl.when(kv == 0)
    def _init_group():
        # Q projection once per (b, qt, head-group); scale already in W_q.
        q = jnp.dot(x_q_ref[0], wq_ref[0], preferred_element_type=jnp.float32)
        q_scr[...] = q.astype(q_scr.dtype)
        m_scr[...] = jnp.full(m_scr.shape, -jnp.inf, dtype=m_scr.dtype)
        l_scr[...] = jnp.zeros_like(l_scr)
        o_scr[...] = jnp.zeros_like(o_scr)

    # K/V projections for this kv tile, all g heads at once (N = g*d_h).
    x_kv = x_kv_ref[0]                                                  # (tkv, D)
    k_all = jnp.dot(x_kv, wk_ref[0],
                    preferred_element_type=jnp.float32).astype(cdt)    # (tkv, g*d_h)
    v_all = jnp.dot(x_kv, wv_ref[0],
                    preferred_element_type=jnp.float32).astype(cdt)    # (tkv, g*d_h)

    # Per-head online softmax; short static loop, all slices static.
    for j in range(g):
        sl = slice(j * d_h, (j + 1) * d_h)
        q_j = q_scr[:, sl]                                              # (tq, d_h)
        k_j = k_all[:, sl]                                              # (tkv, d_h)
        v_j = v_all[:, sl]                                              # (tkv, d_h)

        # scores = q_j @ k_j^T without materializing a transpose.
        s = lax.dot_general(q_j, k_j, (((1,), (1,)), ((), ())),
                            preferred_element_type=jnp.float32)         # (tq, tkv) f32

        m_prev = m_scr[j]                                               # (tq, 1) f32
        m_new = jnp.maximum(m_prev, jnp.max(s, axis=-1, keepdims=True))
        alpha = jnp.exp(m_prev - m_new)                                 # f32 rescale
        # exp in exp_dtype (bf16 on v6e/v7x); max-sub and denom stay in f32.
        p = jnp.exp((s - m_new).astype(exp_dtype))                      # (tq, tkv)
        l_scr[j] = alpha * l_scr[j] + jnp.sum(p, axis=-1, keepdims=True,
                                              dtype=jnp.float32)
        pv = jnp.dot(p.astype(cdt), v_j,
                     preferred_element_type=jnp.float32)                # (tq, d_h) f32
        o_scr[:, sl] = alpha * o_scr[:, sl] + pv
        m_scr[j] = m_new

    @pl.when(kv == n_kv - 1)
    def _fold_group_into_projection():
        # Normalize each head, then one K = g*d_h matmul into the accumulator
        # (head-concat folded into the output projection).
        for j in range(g):
            sl = slice(j * d_h, (j + 1) * d_h)
            o_scr[:, sl] = o_scr[:, sl] * pl.reciprocal(l_scr[j],
                                                        approx=approx_recip)
        acc_ref[...] += jnp.dot(o_scr[...].astype(cdt), wo_ref[0],
                                preferred_element_type=jnp.float32)     # (tq, D)

    @pl.when((kv == n_kv - 1) & (hg == n_hg - 1))
    def _write_out():
        o_ref[0] = acc_ref[...].astype(o_ref.dtype)


# ----------------------------------------------------------------------------
# Wrapper
# ----------------------------------------------------------------------------
def multi_head_attention(x, params, *, q_tile=256, kv_tile=512, exp_dtype=None):
    """Eval-mode MHA matching the PyTorch module (mask=None, dropout=identity).

    x: (B, S, D). `params` comes from prepare_mha_params() (cached weight prep).
    """
    B, S, D = x.shape
    g = params["group_size"]
    d_h = params["d_h"]
    n_head = params["n_head"]
    G = n_head // g
    cdt = params["compute_dtype"]
    assert n_head * d_h == D

    tq = _pick_tile(S, q_tile)
    tkv = _pick_tile(S, kv_tile)
    QT, KVT = S // tq, S // tkv

    if exp_dtype is None:
        exp_dtype = (jnp.bfloat16
                     if (cdt == jnp.dtype(jnp.bfloat16) and _bf16_elementwise_ok())
                     else jnp.float32)
    approx_recip = (cdt == jnp.dtype(jnp.bfloat16))

    kernel = functools.partial(
        _mha_flash_kernel, g=g, d_h=d_h, compute_dtype=cdt,
        exp_dtype=jnp.dtype(exp_dtype), approx_recip=approx_recip)

    x_c = x.astype(cdt)
    gd = g * d_h

    return pl.pallas_call(
        kernel,
        out_shape=jax.ShapeDtypeStruct((B, S, D), x.dtype),
        grid_spec=pltpu.PrefetchScalarGridSpec(
            num_scalar_prefetch=0,
            grid=(B, QT, G, KVT),
            in_specs=[
                pl.BlockSpec((1, tq, D), lambda b, qt, hg, kv: (b, qt, 0)),    # x (Q rows)
                pl.BlockSpec((1, tkv, D), lambda b, qt, hg, kv: (b, kv, 0)),   # x (KV rows)
                pl.BlockSpec((1, D, gd), lambda b, qt, hg, kv: (hg, 0, 0)),    # W_q[group]
                pl.BlockSpec((1, D, gd), lambda b, qt, hg, kv: (hg, 0, 0)),    # W_k[group]
                pl.BlockSpec((1, D, gd), lambda b, qt, hg, kv: (hg, 0, 0)),    # W_v[group]
                pl.BlockSpec((1, gd, D), lambda b, qt, hg, kv: (hg, 0, 0)),    # W_out[group]
            ],
            out_specs=pl.BlockSpec((1, tq, D), lambda b, qt, hg, kv: (b, qt, 0)),
            scratch_shapes=[
                pltpu.VMEM((tq, D), jnp.float32),    # acc over head groups
                pltpu.VMEM((tq, gd), cdt),           # q projection (per group)
                pltpu.VMEM((tq, gd), jnp.float32),   # unnormalized PV accum
                pltpu.VMEM((g, tq, 1), jnp.float32), # running max
                pltpu.VMEM((g, tq, 1), jnp.float32), # running denom
            ],
        ),
        compiler_params=pltpu.CompilerParams(
            dimension_semantics=("parallel", "parallel", "arbitrary", "arbitrary"),
            vmem_limit_bytes=_vmem_limit_bytes(),
        ),
    )(x_c, x_c, params["w_q"], params["w_k"], params["w_v"], params["w_o"])


# ----------------------------------------------------------------------------
# Pure-JAX reference (mirror of the PyTorch forward, eval mode, mask=None).
# ----------------------------------------------------------------------------
def _reference(x, w_qkv, w_out, n_head):
    B, S, D = x.shape
    d_h = D // n_head
    qkv = (x @ w_qkv.T).reshape(B, S, 3, n_head, d_h)
    q = jnp.transpose(qkv[:, :, 0], (0, 2, 1, 3))
    k = jnp.transpose(qkv[:, :, 1], (0, 2, 1, 3))
    v = jnp.transpose(qkv[:, :, 2], (0, 2, 1, 3))
    attn = (q @ jnp.swapaxes(k, -2, -1)) / (d_h ** 0.5)
    attn = jax.nn.softmax(attn, axis=-1)
    out = jnp.transpose(attn @ v, (0, 2, 1, 3)).reshape(B, S, D)
    return out @ w_out.T


if __name__ == "__main__":
    key = jax.random.PRNGKey(0)
    kx, kq, ko, kx2, kq2, ko2 = jax.random.split(key, 6)

    # ---- Test 1: module-consistent small shape, default bf16 compute path.
    B, S, D, H = 2, 8, 32, 4
    x = jax.random.normal(kx, (B, S, D), dtype=jnp.float32)
    w_qkv = jax.random.normal(kq, (3 * D, D), dtype=jnp.float32) * (1.0 / D ** 0.5)
    w_out = jax.random.normal(ko, (D, D), dtype=jnp.float32) * (1.0 / D ** 0.5)
    ref = _reference(x, w_qkv, w_out, H)

    # bf16 default (f32 accumulation / softmax stats): loose tolerance.
    params_bf16 = prepare_mha_params(w_qkv, w_out, n_head=H)  # cached one-time prep
    out_bf16 = jax.block_until_ready(multi_head_attention(x, params_bf16))
    assert out_bf16.shape == (B, S, D)
    assert jnp.allclose(out_bf16.astype(jnp.float32), ref, atol=2e-1, rtol=2e-1)

    # f32 compute path: tight tolerance against the pure-JAX reference.
    params_f32 = prepare_mha_params(w_qkv, w_out, n_head=H,
                                    compute_dtype=jnp.float32)
    out_f32 = jax.block_until_ready(multi_head_attention(x, params_f32))
    assert jnp.allclose(out_f32, ref, atol=2e-4, rtol=2e-4)

    # ---- Test 2: exercise multi-tile grid (QT>1, G>1, KVT>1) in f32.
    B2, S2, D2, H2 = 2, 16, 64, 8
    x2 = jax.random.normal(kx2, (B2, S2, D2), dtype=jnp.float32)
    w_qkv2 = jax.random.normal(kq2, (3 * D2, D2), dtype=jnp.float32) * (1.0 / D2 ** 0.5)
    w_out2 = jax.random.normal(ko2, (D2, D2), dtype=jnp.float32) * (1.0 / D2 ** 0.5)
    ref2 = _reference(x2, w_qkv2, w_out2, H2)

    params2 = prepare_mha_params(w_qkv2, w_out2, n_head=H2,
                                 compute_dtype=jnp.float32, group_size=2)
    out2 = jax.block_until_ready(
        multi_head_attention(x2, params2, q_tile=8, kv_tile=8))
    assert out2.shape == (B2, S2, D2)
    assert jnp.allclose(out2, ref2, atol=1e-3, rtol=1e-3)

    print("KERNEL_OK")
</pallas_src>

<mosaic_0001>
module attributes {stable_mosaic.version = 11 : i64} {
  func.func @_mha_flash_kernel(%arg0: i32, %arg1: i32, %arg2: i32, %arg3: i32, %arg4: memref<1x8x32xbf16, #tpu.memory_space<vmem>>, %arg5: memref<1x8x32xbf16, #tpu.memory_space<vmem>>, %arg6: memref<1x32x32xbf16, #tpu.memory_space<vmem>>, %arg7: memref<1x32x32xbf16, #tpu.memory_space<vmem>>, %arg8: memref<1x32x32xbf16, #tpu.memory_space<vmem>>, %arg9: memref<1x32x32xbf16, #tpu.memory_space<vmem>>, %arg10: memref<1x8x32xf32, #tpu.memory_space<vmem>>, %arg11: memref<8x32xf32, #tpu.memory_space<vmem>>, %arg12: memref<8x32xbf16, #tpu.memory_space<vmem>>, %arg13: memref<8x32xf32, #tpu.memory_space<vmem>>, %arg14: memref<4x8x1xf32, #tpu.memory_space<vmem>>, %arg15: memref<4x8x1xf32, #tpu.memory_space<vmem>>) attributes {dimension_semantics = [#tpu.dimension_semantics<parallel>, #tpu.dimension_semantics<parallel>, #tpu.dimension_semantics<arbitrary>, #tpu.dimension_semantics<arbitrary>], iteration_bounds = array<i64: 2, 1, 1, 1>, scalar_prefetch = 0 : i64, scratch_operands = 5 : i64, tpu.core_type = #tpu.core_type<tc>, window_params = [{transform_indices = @transform_0, window_bounds = array<i64: 1, 8, 32>}, {transform_indices = @transform_1, window_bounds = array<i64: 1, 8, 32>}, {transform_indices = @transform_2, window_bounds = array<i64: 1, 32, 32>}, {transform_indices = @transform_3, window_bounds = array<i64: 1, 32, 32>}, {transform_indices = @transform_4, window_bounds = array<i64: 1, 32, 32>}, {transform_indices = @transform_5, window_bounds = array<i64: 1, 32, 32>}, {transform_indices = @transform_6, window_bounds = array<i64: 1, 8, 32>}]} {
    %c0_i32 = arith.constant 0 : i32
    %0 = arith.cmpi eq, %arg2, %c0_i32 : i32
    %c0_i32_0 = arith.constant 0 : i32
    %1 = arith.cmpi eq, %arg3, %c0_i32_0 : i32
    %2 = arith.andi %0, %1 : i1
    %3 = arith.extui %2 : i1 to i32
    %c0_i32_1 = arith.constant 0 : i32
    %4 = arith.cmpi ne, %3, %c0_i32_1 : i32
    scf.if %4 {
      %cst_100 = arith.constant 0.000000e+00 : f32
      %158 = vector.broadcast %cst_100 : f32 to vector<8x32xf32>
      %c0_101 = arith.constant 0 : index
      %c0_102 = arith.constant 0 : index
      %159 = vector.load %arg11[%c0_101, %c0_102] : memref<8x32xf32, #tpu.memory_space<vmem>>, vector<8x32xf32>
      tpu.vector_store %arg11[%c0_101, %c0_102], %158 {strides = array<i32>} : memref<8x32xf32, #tpu.memory_space<vmem>>, vector<8x32xf32>,
    } else {
    }
    %c0_i32_2 = arith.constant 0 : i32
    %5 = arith.cmpi eq, %arg3, %c0_i32_2 : i32
    %6 = arith.extui %5 : i1 to i32
    %c0_i32_3 = arith.constant 0 : i32
    %7 = arith.cmpi ne, %6, %c0_i32_3 : i32
    scf.if %7 {
      %c0_100 = arith.constant 0 : index
      %c0_101 = arith.constant 0 : index
      %c0_102 = arith.constant 0 : index
      %158 = vector.load %arg4[%c0_100, %c0_101, %c0_102] : memref<1x8x32xbf16, #tpu.memory_space<vmem>>, vector<1x8x32xbf16>
      %159 = vector.shape_cast %158 : vector<1x8x32xbf16> to vector<8x32xbf16>
      %c0_103 = arith.constant 0 : index
      %c0_104 = arith.constant 0 : index
      %c0_105 = arith.constant 0 : index
      %160 = vector.load %arg6[%c0_103, %c0_104, %c0_105] : memref<1x32x32xbf16, #tpu.memory_space<vmem>>, vector<1x32x32xbf16>
      %161 = vector.shape_cast %160 : vector<1x32x32xbf16> to vector<32x32xbf16>
      %cst_106 = arith.constant dense<0.000000e+00> : vector<8x32xf32>
      %162 = tpu.matmul %159, %161, %cst_106 {dimension_numbers = #tpu.dot_dimension_numbers<[1], [0], [0], [1], [0, 0, 1, 1], [], []>} : vector<8x32xbf16>, vector<32x32xbf16>, vector<8x32xf32> -> vector<8x32xf32>
      %163 = arith.truncf %162 : vector<8x32xf32> to vector<8x32xbf16>
      %c0_107 = arith.constant 0 : index
      %c0_108 = arith.constant 0 : index
      %164 = vector.load %arg12[%c0_107, %c0_108] : memref<8x32xbf16, #tpu.memory_space<vmem>>, vector<8x32xbf16>
      tpu.vector_store %arg12[%c0_107, %c0_108], %163 {strides = array<i32>} : memref<8x32xbf16, #tpu.memory_space<vmem>>, vector<8x32xbf16>,
      %cst_109 = arith.constant 0xFF800000 : f32
      %165 = vector.broadcast %cst_109 : f32 to vector<4x8x1xf32>
      %c0_110 = arith.constant 0 : index
      %c0_111 = arith.constant 0 : index
      %c0_112 = arith.constant 0 : index
      %166 = vector.load %arg14[%c0_110, %c0_111, %c0_112] : memref<4x8x1xf32, #tpu.memory_space<vmem>>, vector<4x8x1xf32>
      tpu.vector_store %arg14[%c0_110, %c0_111, %c0_112], %165 {strides = array<i32>} : memref<4x8x1xf32, #tpu.memory_space<vmem>>, vector<4x8x1xf32>,
      %cst_113 = arith.constant 0.000000e+00 : f32
      %167 = vector.broadcast %cst_113 : f32 to vector<4x8x1xf32>
      %c0_114 = arith.constant 0 : index
      %c0_115 = arith.constant 0 : index
      %c0_116 = arith.constant 0 : index
      %168 = vector.load %arg15[%c0_114, %c0_115, %c0_116] : memref<4x8x1xf32, #tpu.memory_space<vmem>>, vector<4x8x1xf32>
      tpu.vector_store %arg15[%c0_114, %c0_115, %c0_116], %167 {strides = array<i32>} : memref<4x8x1xf32, #tpu.memory_space<vmem>>, vector<4x8x1xf32>,
      %cst_117 = arith.constant 0.000000e+00 : f32
      %169 = vector.broadcast %cst_117 : f32 to vector<8x32xf32>
      %c0_118 = arith.constant 0 : index
      %c0_119 = arith.constant 0 : index
      %170 = vector.load %arg13[%c0_118, %c0_119] : memref<8x32xf32, #tpu.memory_space<vmem>>, vector<8x32xf32>
      tpu.vector_store %arg13[%c0_118, %c0_119], %169 {strides = array<i32>} : memref<8x32xf32, #tpu.memory_space<vmem>>, vector<8x32xf32>,
    } else {
    }
    %c0 = arith.constant 0 : index
    %c0_4 = arith.constant 0 : index
    %c0_5 = arith.constant 0 : index
    %8 = vector.load %arg5[%c0, %c0_4, %c0_5] : memref<1x8x32xbf16, #tpu.memory_space<vmem>>, vector<1x8x32xbf16>
    %9 = vector.shape_cast %8 : vector<1x8x32xbf16> to vector<8x32xbf16>
    %c0_6 = arith.constant 0 : index
    %c0_7 = arith.constant 0 : index
    %c0_8 = arith.constant 0 : index
    %10 = vector.load %arg7[%c0_6, %c0_7, %c0_8] : memref<1x32x32xbf16, #tpu.memory_space<vmem>>, vector<1x32x32xbf16>
    %11 = vector.shape_cast %10 : vector<1x32x32xbf16> to vector<32x32xbf16>
    %cst = arith.constant dense<0.000000e+00> : vector<8x32xf32>
    %12 = tpu.matmul %9, %11, %cst {dimension_numbers = #tpu.dot_dimension_numbers<[1], [0], [0], [1], [0, 0, 1, 1], [], []>} : vector<8x32xbf16>, vector<32x32xbf16>, vector<8x32xf32> -> vector<8x32xf32>
    %13 = arith.truncf %12 : vector<8x32xf32> to vector<8x32xbf16>
    %c0_9 = arith.constant 0 : index
    %c0_10 = arith.constant 0 : index
    %c0_11 = arith.constant 0 : index
    %14 = vector.load %arg8[%c0_9, %c0_10, %c0_11] : memref<1x32x32xbf16, #tpu.memory_space<vmem>>, vector<1x32x32xbf16>
    %15 = vector.shape_cast %14 : vector<1x32x32xbf16> to vector<32x32xbf16>
    %cst_12 = arith.constant dense<0.000000e+00> : vector<8x32xf32>
    %16 = tpu.matmul %9, %15, %cst_12 {dimension_numbers = #tpu.dot_dimension_numbers<[1], [0], [0], [1], [0, 0, 1, 1], [], []>} : vector<8x32xbf16>, vector<32x32xbf16>, vector<8x32xf32> -> vector<8x32xf32>
    %17 = arith.truncf %16 : vector<8x32xf32> to vector<8x32xbf16>
    %c0_13 = arith.constant 0 : index
    %c0_14 = arith.constant 0 : index
    %18 = vector.load %arg12[%c0_13, %c0_14] : memref<8x32xbf16, #tpu.memory_space<vmem>>, vector<8x8xbf16>
    %19 = vector.extract_strided_slice %13 {offsets = [0, 0], sizes = [8, 8], strides = [1, 1]} : vector<8x32xbf16> to vector<8x8xbf16>
    %20 = vector.extract_strided_slice %17 {offsets = [0, 0], sizes = [8, 8], strides = [1, 1]} : vector<8x32xbf16> to vector<8x8xbf16>
    %cst_15 = arith.constant dense<0.000000e+00> : vector<8x8xf32>
    %21 = tpu.matmul %18, %19, %cst_15 {dimension_numbers = #tpu.dot_dimension_numbers<[1], [1], [0], [0], [0, 0, 1, 0], [], []>} : vector<8x8xbf16>, vector<8x8xbf16>, vector<8x8xf32> -> vector<8x8xf32>
    %c0_16 = arith.constant 0 : index
    %c0_17 = arith.constant 0 : index
    %c0_18 = arith.constant 0 : index
    %22 = vector.load %arg14[%c0_16, %c0_17, %c0_18] : memref<4x8x1xf32, #tpu.memory_space<vmem>>, vector<1x8x1xf32>
    %23 = vector.shape_cast %22 : vector<1x8x1xf32> to vector<8x1xf32>
    %cst_19 = arith.constant dense<0xFF800000> : vector<8xf32>
    %24 = vector.multi_reduction <maximumf>, %21, %cst_19 [1] : vector<8x8xf32> to vector<8xf32>
    %25 = vector.shape_cast %24 : vector<8xf32> to vector<8x1xf32>
    %26 = arith.maximumf %23, %25 : vector<8x1xf32>
    %27 = arith.subf %23, %26 : vector<8x1xf32>
    %28 = math.exp %27 : vector<8x1xf32>
    %29 = vector.broadcast %26 : vector<8x1xf32> to vector<8x8xf32>
    %30 = arith.subf %21, %29 : vector<8x8xf32>
    %31 = math.exp %30 : vector<8x8xf32>
    %c0_20 = arith.constant 0 : index
    %c0_21 = arith.constant 0 : index
    %c0_22 = arith.constant 0 : index
    %32 = vector.load %arg15[%c0_20, %c0_21, %c0_22] : memref<4x8x1xf32, #tpu.memory_space<vmem>>, vector<1x8x1xf32>
    %33 = vector.shape_cast %32 : vector<1x8x1xf32> to vector<8x1xf32>
    %34 = arith.mulf %28, %33 : vector<8x1xf32>
    %cst_23 = arith.constant dense<0.000000e+00> : vector<8xf32>
    %35 = vector.multi_reduction <add>, %31, %cst_23 [1] : vector<8x8xf32> to vector<8xf32>
    %36 = vector.shape_cast %35 : vector<8xf32> to vector<8x1xf32>
    %37 = arith.addf %34, %36 : vector<8x1xf32>
    %c0_24 = arith.constant 0 : index
    %c0_25 = arith.constant 0 : index
    %c0_26 = arith.constant 0 : index
    %38 = vector.load %arg15[%c0_24, %c0_25, %c0_26] : memref<4x8x1xf32, #tpu.memory_space<vmem>>, vector<1x8x1xf32>
    %39 = vector.shape_cast %38 : vector<1x8x1xf32> to vector<8x1xf32>
    %40 = vector.shape_cast %37 : vector<8x1xf32> to vector<1x8x1xf32>
    tpu.vector_store %arg15[%c0_24, %c0_25, %c0_26], %40 {strides = array<i32>} : memref<4x8x1xf32, #tpu.memory_space<vmem>>, vector<1x8x1xf32>,
    %41 = arith.truncf %31 : vector<8x8xf32> to vector<8x8xbf16>
    %cst_27 = arith.constant dense<0.000000e+00> : vector<8x8xf32>
    %42 = tpu.matmul %41, %20, %cst_27 {dimension_numbers = #tpu.dot_dimension_numbers<[1], [0], [0], [1], [0, 0, 1, 1], [], []>} : vector<8x8xbf16>, vector<8x8xbf16>, vector<8x8xf32> -> vector<8x8xf32>
    %c0_28 = arith.constant 0 : index
    %c0_29 = arith.constant 0 : index
    %43 = vector.load %arg13[%c0_28, %c0_29] : memref<8x32xf32, #tpu.memory_space<vmem>>, vector<8x8xf32>
    %44 = vector.broadcast %28 : vector<8x1xf32> to vector<8x8xf32>
    %45 = arith.mulf %44, %43 : vector<8x8xf32>
    %46 = arith.addf %45, %42 : vector<8x8xf32>
    %c0_30 = arith.constant 0 : index
    %c0_31 = arith.constant 0 : index
    %47 = vector.load %arg13[%c0_30, %c0_31] : memref<8x32xf32, #tpu.memory_space<vmem>>, vector<8x8xf32>
    tpu.vector_store %arg13[%c0_30, %c0_31], %46 {strides = array<i32>} : memref<8x32xf32, #tpu.memory_space<vmem>>, vector<8x8xf32>,
    %c0_32 = arith.constant 0 : index
    %c0_33 = arith.constant 0 : index
    %c0_34 = arith.constant 0 : index
    %48 = vector.load %arg14[%c0_32, %c0_33, %c0_34] : memref<4x8x1xf32, #tpu.memory_space<vmem>>, vector<1x8x1xf32>
    %49 = vector.shape_cast %48 : vector<1x8x1xf32> to vector<8x1xf32>
    %50 = vector.shape_cast %26 : vector<8x1xf32> to vector<1x8x1xf32>
    tpu.vector_store %arg14[%c0_32, %c0_33, %c0_34], %50 {strides = array<i32>} : memref<4x8x1xf32, #tpu.memory_space<vmem>>, vector<1x8x1xf32>,
    %c0_35 = arith.constant 0 : index
    %c8 = arith.constant 8 : index
    %51 = vector.load %arg12[%c0_35, %c8] : memref<8x32xbf16, #tpu.memory_space<vmem>>, vector<8x8xbf16>
    %52 = vector.extract_strided_slice %13 {offsets = [0, 8], sizes = [8, 8], strides = [1, 1]} : vector<8x32xbf16> to vector<8x8xbf16>
    %53 = vector.extract_strided_slice %17 {offsets = [0, 8], sizes = [8, 8], strides = [1, 1]} : vector<8x32xbf16> to vector<8x8xbf16>
    %cst_36 = arith.constant dense<0.000000e+00> : vector<8x8xf32>
    %54 = tpu.matmul %51, %52, %cst_36 {dimension_numbers = #tpu.dot_dimension_numbers<[1], [1], [0], [0], [0, 0, 1, 0], [], []>} : vector<8x8xbf16>, vector<8x8xbf16>, vector<8x8xf32> -> vector<8x8xf32>
    %c1 = arith.constant 1 : index
    %c0_37 = arith.constant 0 : index
    %c0_38 = arith.constant 0 : index
    %55 = vector.load %arg14[%c1, %c0_37, %c0_38] : memref<4x8x1xf32, #tpu.memory_space<vmem>>, vector<1x8x1xf32>
    %56 = vector.shape_cast %55 : vector<1x8x1xf32> to vector<8x1xf32>
    %cst_39 = arith.constant dense<0xFF800000> : vector<8xf32>
    %57 = vector.multi_reduction <maximumf>, %54, %cst_39 [1] : vector<8x8xf32> to vector<8xf32>
    %58 = vector.shape_cast %57 : vector<8xf32> to vector<8x1xf32>
    %59 = arith.maximumf %56, %58 : vector<8x1xf32>
    %60 = arith.subf %56, %59 : vector<8x1xf32>
    %61 = math.exp %60 : vector<8x1xf32>
    %62 = vector.broadcast %59 : vector<8x1xf32> to vector<8x8xf32>
    %63 = arith.subf %54, %62 : vector<8x8xf32>
    %64 = math.exp %63 : vector<8x8xf32>
    %c1_40 = arith.constant 1 : index
    %c0_41 = arith.constant 0 : index
    %c0_42 = arith.constant 0 : index
    %65 = vector.load %arg15[%c1_40, %c0_41, %c0_42] : memref<4x8x1xf32, #tpu.memory_space<vmem>>, vector<1x8x1xf32>
    %66 = vector.shape_cast %65 : vector<1x8x1xf32> to vector<8x1xf32>
    %67 = arith.mulf %61, %66 : vector<8x1xf32>
    %cst_43 = arith.constant dense<0.000000e+00> : vector<8xf32>
    %68 = vector.multi_reduction <add>, %64, %cst_43 [1] : vector<8x8xf32> to vector<8xf32>
    %69 = vector.shape_cast %68 : vector<8xf32> to vector<8x1xf32>
    %70 = arith.addf %67, %69 : vector<8x1xf32>
    %c1_44 = arith.constant 1 : index
    %c0_45 = arith.constant 0 : index
    %c0_46 = arith.constant 0 : index
    %71 = vector.load %arg15[%c1_44, %c0_45, %c0_46] : memref<4x8x1xf32, #tpu.memory_space<vmem>>, vector<1x8x1xf32>
    %72 = vector.shape_cast %71 : vector<1x8x1xf32> to vector<8x1xf32>
    %73 = vector.shape_cast %70 : vector<8x1xf32> to vector<1x8x1xf32>
    tpu.vector_store %arg15[%c1_44, %c0_45, %c0_46], %73 {strides = array<i32>} : memref<4x8x1xf32, #tpu.memory_space<vmem>>, vector<1x8x1xf32>,
    %74 = arith.truncf %64 : vector<8x8xf32> to vector<8x8xbf16>
    %cst_47 = arith.constant dense<0.000000e+00> : vector<8x8xf32>
    %75 = tpu.matmul %74, %53, %cst_47 {dimension_numbers = #tpu.dot_dimension_numbers<[1], [0], [0], [1], [0, 0, 1, 1], [], []>} : vector<8x8xbf16>, vector<8x8xbf16>, vector<8x8xf32> -> vector<8x8xf32>
    %c0_48 = arith.constant 0 : index
    %c8_49 = arith.constant 8 : index
    %76 = vector.load %arg13[%c0_48, %c8_49] : memref<8x32xf32, #tpu.memory_space<vmem>>, vector<8x8xf32>
    %77 = vector.broadcast %61 : vector<8x1xf32> to vector<8x8xf32>
    %78 = arith.mulf %77, %76 : vector<8x8xf32>
    %79 = arith.addf %78, %75 : vector<8x8xf32>
    %c0_50 = arith.constant 0 : index
    %c8_51 = arith.constant 8 : index
    %80 = vector.load %arg13[%c0_50, %c8_51] : memref<8x32xf32, #tpu.memory_space<vmem>>, vector<8x8xf32>
    tpu.vector_store %arg13[%c0_50, %c8_51], %79 {strides = array<i32>} : memref<8x32xf32, #tpu.memory_space<vmem>>, vector<8x8xf32>,
    %c1_52 = arith.constant 1 : index
    %c0_53 = arith.constant 0 : index
    %c0_54 = arith.constant 0 : index
    %81 = vector.load %arg14[%c1_52, %c0_53, %c0_54] : memref<4x8x1xf32, #tpu.memory_space<vmem>>, vector<1x8x1xf32>
    %82 = vector.shape_cast %81 : vector<1x8x1xf32> to vector<8x1xf32>
    %83 = vector.shape_cast %59 : vector<8x1xf32> to vector<1x8x1xf32>
    tpu.vector_store %arg14[%c1_52, %c0_53, %c0_54], %83 {strides = array<i32>} : memref<4x8x1xf32, #tpu.memory_space<vmem>>, vector<1x8x1xf32>,
    %c0_55 = arith.constant 0 : index
    %c16 = arith.constant 16 : index
    %84 = vector.load %arg12[%c0_55, %c16] : memref<8x32xbf16, #tpu.memory_space<vmem>>, vector<8x8xbf16>
    %85 = vector.extract_strided_slice %13 {offsets = [0, 16], sizes = [8, 8], strides = [1, 1]} : vector<8x32xbf16> to vector<8x8xbf16>
    %86 = vector.extract_strided_slice %17 {offsets = [0, 16], sizes = [8, 8], strides = [1, 1]} : vector<8x32xbf16> to vector<8x8xbf16>
    %cst_56 = arith.constant dense<0.000000e+00> : vector<8x8xf32>
    %87 = tpu.matmul %84, %85, %cst_56 {dimension_numbers = #tpu.dot_dimension_numbers<[1], [1], [0], [0], [0, 0, 1, 0], [], []>} : vector<8x8xbf16>, vector<8x8xbf16>, vector<8x8xf32> -> vector<8x8xf32>
    %c2 = arith.constant 2 : index
    %c0_57 = arith.constant 0 : index
    %c0_58 = arith.constant 0 : index
    %88 = vector.load %arg14[%c2, %c0_57, %c0_58] : memref<4x8x1xf32, #tpu.memory_space<vmem>>, vector<1x8x1xf32>
    %89 = vector.shape_cast %88 : vector<1x8x1xf32> to vector<8x1xf32>
    %cst_59 = arith.constant dense<0xFF800000> : vector<8xf32>
    %90 = vector.multi_reduction <maximumf>, %87, %cst_59 [1] : vector<8x8xf32> to vector<8xf32>
    %91 = vector.shape_cast %90 : vector<8xf32> to vector<8x1xf32>
    %92 = arith.maximumf %89, %91 : vector<8x1xf32>
    %93 = arith.subf %89, %92 : vector<8x1xf32>
    %94 = math.exp %93 : vector<8x1xf32>
    %95 = vector.broadcast %92 : vector<8x1xf32> to vector<8x8xf32>
    %96 = arith.subf %87, %95 : vector<8x8xf32>
    %97 = math.exp %96 : vector<8x8xf32>
    %c2_60 = arith.constant 2 : index
    %c0_61 = arith.constant 0 : index
    %c0_62 = arith.constant 0 : index
    %98 = vector.load %arg15[%c2_60, %c0_61, %c0_62] : memref<4x8x1xf32, #tpu.memory_space<vmem>>, vector<1x8x1xf32>
    %99 = vector.shape_cast %98 : vector<1x8x1xf32> to vector<8x1xf32>
    %100 = arith.mulf %94, %99 : vector<8x1xf32>
    %cst_63 = arith.constant dense<0.000000e+00> : vector<8xf32>
    %101 = vector.multi_reduction <add>, %97, %cst_63 [1] : vector<8x8xf32> to vector<8xf32>
    %102 = vector.shape_cast %101 : vector<8xf32> to vector<8x1xf32>
    %103 = arith.addf %100, %102 : vector<8x1xf32>
    %c2_64 = arith.constant 2 : index
    %c0_65 = arith.constant 0 : index
    %c0_66 = arith.constant 0 : index
    %104 = vector.load %arg15[%c2_64, %c0_65, %c0_66] : memref<4x8x1xf32, #tpu.memory_space<vmem>>, vector<1x8x1xf32>
    %105 = vector.shape_cast %104 : vector<1x8x1xf32> to vector<8x1xf32>
    %106 = vector.shape_cast %103 : vector<8x1xf32> to vector<1x8x1xf32>
    tpu.vector_store %arg15[%c2_64, %c0_65, %c0_66], %106 {strides = array<i32>} : memref<4x8x1xf32, #tpu.memory_space<vmem>>, vector<1x8x1xf32>,
    %107 = arith.truncf %97 : vector<8x8xf32> to vector<8x8xbf16>
    %cst_67 = arith.constant dense<0.000000e+00> : vector<8x8xf32>
    %108 = tpu.matmul %107, %86, %cst_67 {dimension_numbers = #tpu.dot_dimension_numbers<[1], [0], [0], [1], [0, 0, 1, 1], [], []>} : vector<8x8xbf16>, vector<8x8xbf16>, vector<8x8xf32> -> vector<8x8xf32>
    %c0_68 = arith.constant 0 : index
    %c16_69 = arith.constant 16 : index
    %109 = vector.load %arg13[%c0_68, %c16_69] : memref<8x32xf32, #tpu.memory_space<vmem>>, vector<8x8xf32>
    %110 = vector.broadcast %94 : vector<8x1xf32> to vector<8x8xf32>
    %111 = arith.mulf %110, %109 : vector<8x8xf32>
    %112 = arith.addf %111, %108 : vector<8x8xf32>
    %c0_70 = arith.constant 0 : index
    %c16_71 = arith.constant 16 : index
    %113 = vector.load %arg13[%c0_70, %c16_71] : memref<8x32xf32, #tpu.memory_space<vmem>>, vector<8x8xf32>
    tpu.vector_store %arg13[%c0_70, %c16_71], %112 {strides = array<i32>} : memref<8x32xf32, #tpu.memory_space<vmem>>, vector<8x8xf32>,
    %c2_72 = arith.constant 2 : index
    %c0_73 = arith.constant 0 : index
    %c0_74 = arith.constant 0 : index
    %114 = vector.load %arg14[%c2_72, %c0_73, %c0_74] : memref<4x8x1xf32, #tpu.memory_space<vmem>>, vector<1x8x1xf32>
    %115 = vector.shape_cast %114 : vector<1x8x1xf32> to vector<8x1xf32>
    %116 = vector.shape_cast %92 : vector<8x1xf32> to vector<1x8x1xf32>
    tpu.vector_store %arg14[%c2_72, %c0_73, %c0_74], %116 {strides = array<i32>} : memref<4x8x1xf32, #tpu.memory_space<vmem>>, vector<1x8x1xf32>,
    %c0_75 = arith.constant 0 : index
    %c24 = arith.constant 24 : index
    %117 = vector.load %arg12[%c0_75, %c24] : memref<8x32xbf16, #tpu.memory_space<vmem>>, vector<8x8xbf16>
    %118 = vector.extract_strided_slice %13 {offsets = [0, 24], sizes = [8, 8], strides = [1, 1]} : vector<8x32xbf16> to vector<8x8xbf16>
    %119 = vector.extract_strided_slice %17 {offsets = [0, 24], sizes = [8, 8], strides = [1, 1]} : vector<8x32xbf16> to vector<8x8xbf16>
    %cst_76 = arith.constant dense<0.000000e+00> : vector<8x8xf32>
    %120 = tpu.matmul %117, %118, %cst_76 {dimension_numbers = #tpu.dot_dimension_numbers<[1], [1], [0], [0], [0, 0, 1, 0], [], []>} : vector<8x8xbf16>, vector<8x8xbf16>, vector<8x8xf32> -> vector<8x8xf32>
    %c3 = arith.constant 3 : index
    %c0_77 = arith.constant 0 : index
    %c0_78 = arith.constant 0 : index
    %121 = vector.load %arg14[%c3, %c0_77, %c0_78] : memref<4x8x1xf32, #tpu.memory_space<vmem>>, vector<1x8x1xf32>
    %122 = vector.shape_cast %121 : vector<1x8x1xf32> to vector<8x1xf32>
    %cst_79 = arith.constant dense<0xFF800000> : vector<8xf32>
    %123 = vector.multi_reduction <maximumf>, %120, %cst_79 [1] : vector<8x8xf32> to vector<8xf32>
    %124 = vector.shape_cast %123 : vector<8xf32> to vector<8x1xf32>
    %125 = arith.maximumf %122, %124 : vector<8x1xf32>
    %126 = arith.subf %122, %125 : vector<8x1xf32>
    %127 = math.exp %126 : vector<8x1xf32>
    %128 = vector.broadcast %125 : vector<8x1xf32> to vector<8x8xf32>
    %129 = arith.subf %120, %128 : vector<8x8xf32>
    %130 = math.exp %129 : vector<8x8xf32>
    %c3_80 = arith.constant 3 : index
    %c0_81 = arith.constant 0 : index
    %c0_82 = arith.constant 0 : index
    %131 = vector.load %arg15[%c3_80, %c0_81, %c0_82] : memref<4x8x1xf32, #tpu.memory_space<vmem>>, vector<1x8x1xf32>
    %132 = vector.shape_cast %131 : vector<1x8x1xf32> to vector<8x1xf32>
    %133 = arith.mulf %127, %132 : vector<8x1xf32>
    %cst_83 = arith.constant dense<0.000000e+00> : vector<8xf32>
    %134 = vector.multi_reduction <add>, %130, %cst_83 [1] : vector<8x8xf32> to vector<8xf32>
    %135 = vector.shape_cast %134 : vector<8xf32> to vector<8x1xf32>
    %136 = arith.addf %133, %135 : vector<8x1xf32>
    %c3_84 = arith.constant 3 : index
    %c0_85 = arith.constant 0 : index
    %c0_86 = arith.constant 0 : index
    %137 = vector.load %arg15[%c3_84, %c0_85, %c0_86] : memref<4x8x1xf32, #tpu.memory_space<vmem>>, vector<1x8x1xf32>
    %138 = vector.shape_cast %137 : vector<1x8x1xf32> to vector<8x1xf32>
    %139 = vector.shape_cast %136 : vector<8x1xf32> to vector<1x8x1xf32>
    tpu.vector_store %arg15[%c3_84, %c0_85, %c0_86], %139 {strides = array<i32>} : memref<4x8x1xf32, #tpu.memory_space<vmem>>, vector<1x8x1xf32>,
    %140 = arith.truncf %130 : vector<8x8xf32> to vector<8x8xbf16>
    %cst_87 = arith.constant dense<0.000000e+00> : vector<8x8xf32>
    %141 = tpu.matmul %140, %119, %cst_87 {dimension_numbers = #tpu.dot_dimension_numbers<[1], [0], [0], [1], [0, 0, 1, 1], [], []>} : vector<8x8xbf16>, vector<8x8xbf16>, vector<8x8xf32> -> vector<8x8xf32>
    %c0_88 = arith.constant 0 : index
    %c24_89 = arith.constant 24 : index
    %142 = vector.load %arg13[%c0_88, %c24_89] : memref<8x32xf32, #tpu.memory_space<vmem>>, vector<8x8xf32>
    %143 = vector.broadcast %127 : vector<8x1xf32> to vector<8x8xf32>
    %144 = arith.mulf %143, %142 : vector<8x8xf32>
    %145 = arith.addf %144, %141 : vector<8x8xf32>
    %c0_90 = arith.constant 0 : index
    %c24_91 = arith.constant 24 : index
    %146 = vector.load %arg13[%c0_90, %c24_91] : memref<8x32xf32, #tpu.memory_space<vmem>>, vector<8x8xf32>
    tpu.vector_store %arg13[%c0_90, %c24_91], %145 {strides = array<i32>} : memref<8x32xf32, #tpu.memory_space<vmem>>, vector<8x8xf32>,
    %c3_92 = arith.constant 3 : index
    %c0_93 = arith.constant 0 : index
    %c0_94 = arith.constant 0 : index
    %147 = vector.load %arg14[%c3_92, %c0_93, %c0_94] : memref<4x8x1xf32, #tpu.memory_space<vmem>>, vector<1x8x1xf32>
    %148 = vector.shape_cast %147 : vector<1x8x1xf32> to vector<8x1xf32>
    %149 = vector.shape_cast %125 : vector<8x1xf32> to vector<1x8x1xf32>
    tpu.vector_store %arg14[%c3_92, %c0_93, %c0_94], %149 {strides = array<i32>} : memref<4x8x1xf32, #tpu.memory_space<vmem>>, vector<1x8x1xf32>,
    %c0_i32_95 = arith.constant 0 : i32
    %150 = arith.cmpi eq, %arg3, %c0_i32_95 : i32
    %151 = arith.extui %150 : i1 to i32
    %c0_i32_96 = arith.constant 0 : i32
    %152 = arith.cmpi ne, %151, %c0_i32_96 : i32
    scf.if %152 {
      %c0_100 = arith.constant 0 : index
      %c0_101 = arith.constant 0 : index
      %158 = vector.load %arg13[%c0_100, %c0_101] : memref<8x32xf32, #tpu.memory_space<vmem>>, vector<8x8xf32>
      %c0_102 = arith.constant 0 : index
      %c0_103 = arith.constant 0 : index
      %c0_104 = arith.constant 0 : index
      %159 = vector.load %arg15[%c0_102, %c0_103, %c0_104] : memref<4x8x1xf32, #tpu.memory_space<vmem>>, vector<1x8x1xf32>
      %160 = vector.shape_cast %159 : vector<1x8x1xf32> to vector<8x1xf32>
      %161 = tpu.reciprocal %160 {approx = true} : vector<8x1xf32> -> vector<8x1xf32>
      %162 = vector.broadcast %161 : vector<8x1xf32> to vector<8x8xf32>
      %163 = arith.mulf %158, %162 : vector<8x8xf32>
      %c0_105 = arith.constant 0 : index
      %c0_106 = arith.constant 0 : index
      %164 = vector.load %arg13[%c0_105, %c0_106] : memref<8x32xf32, #tpu.memory_space<vmem>>, vector<8x8xf32>
      tpu.vector_store %arg13[%c0_105, %c0_106], %163 {strides = array<i32>} : memref<8x32xf32, #tpu.memory_space<vmem>>, vector<8x8xf32>,
      %c0_107 = arith.constant 0 : index
      %c8_108 = arith.constant 8 : index
      %165 = vector.load %arg13[%c0_107, %c8_108] : memref<8x32xf32, #tpu.memory_space<vmem>>, vector<8x8xf32>
      %c1_109 = arith.constant 1 : index
      %c0_110 = arith.constant 0 : index
      %c0_111 = arith.constant 0 : index
      %166 = vector.load %arg15[%c1_109, %c0_110, %c0_111] : memref<4x8x1xf32, #tpu.memory_space<vmem>>, vector<1x8x1xf32>
      %167 = vector.shape_cast %166 : vector<1x8x1xf32> to vector<8x1xf32>
      %168 = tpu.reciprocal %167 {approx = true} : vector<8x1xf32> -> vector<8x1xf32>
      %169 = vector.broadcast %168 : vector<8x1xf32> to vector<8x8xf32>
      %170 = arith.mulf %165, %169 : vector<8x8xf32>
      %c0_112 = arith.constant 0 : index
      %c8_113 = arith.constant 8 : index
      %171 = vector.load %arg13[%c0_112, %c8_113] : memref<8x32xf32, #tpu.memory_space<vmem>>, vector<8x8xf32>
      tpu.vector_store %arg13[%c0_112, %c8_113], %170 {strides = array<i32>} : memref<8x32xf32, #tpu.memory_space<vmem>>, vector<8x8xf32>,
      %c0_114 = arith.constant 0 : index
      %c16_115 = arith.constant 16 : index
      %172 = vector.load %arg13[%c0_114, %c16_115] : memref<8x32xf32, #tpu.memory_space<vmem>>, vector<8x8xf32>
      %c2_116 = arith.constant 2 : index
      %c0_117 = arith.constant 0 : index
      %c0_118 = arith.constant 0 : index
      %173 = vector.load %arg15[%c2_116, %c0_117, %c0_118] : memref<4x8x1xf32, #tpu.memory_space<vmem>>, vector<1x8x1xf32>
      %174 = vector.shape_cast %173 : vector<1x8x1xf32> to vector<8x1xf32>
      %175 = tpu.reciprocal %174 {approx = true} : vector<8x1xf32> -> vector<8x1xf32>
      %176 = vector.broadcast %175 : vector<8x1xf32> to vector<8x8xf32>
      %177 = arith.mulf %172, %176 : vector<8x8xf32>
      %c0_119 = arith.constant 0 : index
      %c16_120 = arith.constant 16 : index
      %178 = vector.load %arg13[%c0_119, %c16_120] : memref<8x32xf32, #tpu.memory_space<vmem>>, vector<8x8xf32>
      tpu.vector_store %arg13[%c0_119, %c16_120], %177 {strides = array<i32>} : memref<8x32xf32, #tpu.memory_space<vmem>>, vector<8x8xf32>,
      %c0_121 = arith.constant 0 : index
      %c24_122 = arith.constant 24 : index
      %179 = vector.load %arg13[%c0_121, %c24_122] : memref<8x32xf32, #tpu.memory_space<vmem>>, vector<8x8xf32>
      %c3_123 = arith.constant 3 : index
      %c0_124 = arith.constant 0 : index
      %c0_125 = arith.constant 0 : index
      %180 = vector.load %arg15[%c3_123, %c0_124, %c0_125] : memref<4x8x1xf32, #tpu.memory_space<vmem>>, vector<1x8x1xf32>
      %181 = vector.shape_cast %180 : vector<1x8x1xf32> to vector<8x1xf32>
      %182 = tpu.reciprocal %181 {approx = true} : vector<8x1xf32> -> vector<8x1xf32>
      %183 = vector.broadcast %182 : vector<8x1xf32> to vector<8x8xf32>
      %184 = arith.mulf %179, %183 : vector<8x8xf32>
      %c0_126 = arith.constant 0 : index
      %c24_127 = arith.constant 24 : index
      %185 = vector.load %arg13[%c0_126, %c24_127] : memref<8x32xf32, #tpu.memory_space<vmem>>, vector<8x8xf32>
      tpu.vector_store %arg13[%c0_126, %c24_127], %184 {strides = array<i32>} : memref<8x32xf32, #tpu.memory_space<vmem>>, vector<8x8xf32>,
      %c0_128 = arith.constant 0 : index
      %c0_129 = arith.constant 0 : index
      %186 = vector.load %arg11[%c0_128, %c0_129] : memref<8x32xf32, #tpu.memory_space<vmem>>, vector<8x32xf32>
      %c0_130 = arith.constant 0 : index
      %c0_131 = arith.constant 0 : index
      %187 = vector.load %arg13[%c0_130, %c0_131] : memref<8x32xf32, #tpu.memory_space<vmem>>, vector<8x32xf32>
      %188 = arith.truncf %187 : vector<8x32xf32> to vector<8x32xbf16>
      %c0_132 = arith.constant 0 : index
      %c0_133 = arith.constant 0 : index
      %c0_134 = arith.constant 0 : index
      %189 = vector.load %arg9[%c0_132, %c0_133, %c0_134] : memref<1x32x32xbf16, #tpu.memory_space<vmem>>, vector<1x32x32xbf16>
      %190 = vector.shape_cast %189 : vector<1x32x32xbf16> to vector<32x32xbf16>
      %cst_135 = arith.constant dense<0.000000e+00> : vector<8x32xf32>
      %191 = tpu.matmul %188, %190, %cst_135 {dimension_numbers = #tpu.dot_dimension_numbers<[1], [0], [0], [1], [0, 0, 1, 1], [], []>} : vector<8x32xbf16>, vector<32x32xbf16>, vector<8x32xf32> -> vector<8x32xf32>
      %192 = arith.addf %186, %191 : vector<8x32xf32>
      %c0_136 = arith.constant 0 : index
      %c0_137 = arith.constant 0 : index
      %193 = vector.load %arg11[%c0_136, %c0_137] : memref<8x32xf32, #tpu.memory_space<vmem>>, vector<8x32xf32>
      tpu.vector_store %arg11[%c0_136, %c0_137], %192 {strides = array<i32>} : memref<8x32xf32, #tpu.memory_space<vmem>>, vector<8x32xf32>,
    } else {
    }
    %c0_i32_97 = arith.constant 0 : i32
    %153 = arith.cmpi eq, %arg3, %c0_i32_97 : i32
    %c0_i32_98 = arith.constant 0 : i32
    %154 = arith.cmpi eq, %arg2, %c0_i32_98 : i32
    %155 = arith.andi %153, %154 : i1
    %156 = arith.extui %155 : i1 to i32
    %c0_i32_99 = arith.constant 0 : i32
    %157 = arith.cmpi ne, %156, %c0_i32_99 : i32
    scf.if %157 {
      %c0_100 = arith.constant 0 : index
      %c0_101 = arith.constant 0 : index
      %158 = vector.load %arg11[%c0_100, %c0_101] : memref<8x32xf32, #tpu.memory_space<vmem>>, vector<8x32xf32>
      %c0_102 = arith.constant 0 : index
      %c0_103 = arith.constant 0 : index
      %c0_104 = arith.constant 0 : index
      %159 = vector.load %arg10[%c0_102, %c0_103, %c0_104] : memref<1x8x32xf32, #tpu.memory_space<vmem>>, vector<1x8x32xf32>
      %160 = vector.shape_cast %159 : vector<1x8x32xf32> to vector<8x32xf32>
      %161 = vector.shape_cast %158 : vector<8x32xf32> to vector<1x8x32xf32>
      tpu.vector_store %arg10[%c0_102, %c0_103, %c0_104], %161 {strides = array<i32>} : memref<1x8x32xf32, #tpu.memory_space<vmem>>, vector<1x8x32xf32>,
    } else {
    }
    return
  }
  func.func @transform_0(%arg0: i32, %arg1: i32, %arg2: i32, %arg3: i32) -> (i32, i32, i32) {
    %c0_i32 = arith.constant 0 : i32
    %c0_i32_0 = arith.constant 0 : i32
    return %arg0, %arg1, %c0_i32 : i32, i32, i32
  }
  func.func @transform_1(%arg0: i32, %arg1: i32, %arg2: i32, %arg3: i32) -> (i32, i32, i32) {
    %c0_i32 = arith.constant 0 : i32
    %c0_i32_0 = arith.constant 0 : i32
    return %arg0, %arg3, %c0_i32 : i32, i32, i32
  }
  func.func @transform_2(%arg0: i32, %arg1: i32, %arg2: i32, %arg3: i32) -> (i32, i32, i32) {
    %c0_i32 = arith.constant 0 : i32
    %c0_i32_0 = arith.constant 0 : i32
    %c0_i32_1 = arith.constant 0 : i32
    return %arg2, %c0_i32, %c0_i32_0 : i32, i32, i32
  }
  func.func @transform_3(%arg0: i32, %arg1: i32, %arg2: i32, %arg3: i32) -> (i32, i32, i32) {
    %c0_i32 = arith.constant 0 : i32
    %c0_i32_0 = arith.constant 0 : i32
    %c0_i32_1 = arith.constant 0 : i32
    return %arg2, %c0_i32, %c0_i32_0 : i32, i32, i32
  }
  func.func @transform_4(%arg0: i32, %arg1: i32, %arg2: i32, %arg3: i32) -> (i32, i32, i32) {
    %c0_i32 = arith.constant 0 : i32
    %c0_i32_0 = arith.constant 0 : i32
    %c0_i32_1 = arith.constant 0 : i32
    return %arg2, %c0_i32, %c0_i32_0 : i32, i32, i32
  }
  func.func @transform_5(%arg0: i32, %arg1: i32, %arg2: i32, %arg3: i32) -> (i32, i32, i32) {
    %c0_i32 = arith.constant 0 : i32
    %c0_i32_0 = arith.constant 0 : i32
    %c0_i32_1 = arith.constant 0 : i32
    return %arg2, %c0_i32, %c0_i32_0 : i32, i32, i32
  }
  func.func @transform_6(%arg0: i32, %arg1: i32, %arg2: i32, %arg3: i32) -> (i32, i32, i32) {
    %c0_i32 = arith.constant 0 : i32
    %c0_i32_0 = arith.constant 0 : i32
    return %arg0, %arg1, %c0_i32 : i32, i32, i32
  }
}

</mosaic_0001>

<bundles_post_ra>
// kernel: tpu_custom_call.1
= control target key start
LH: loop header
LB: loop body
LE: loop exit
PB: predicated region body
PF: predicated region fallthrough
CT: control target
= control target key end

     0   :  { %s2011_s0 = inlined_call_operand.hbm [shape: bf16[2,8,32], index: 0, kind: input, shape index: {}]   ;;  %s2012_s1 = inlined_call_operand.hbm [shape: bf16[2,8,32], index: 1, kind: input, shape index: {}]   ;;  %s2013_s2 = inlined_call_operand.hbm [shape: bf16[1,32,32], index: 2, kind: input, shape index: {}]   ;;  %s2014_s3 = inlined_call_operand.hbm [shape: bf16[1,32,32], index: 3, kind: input, shape index: {}]   ;;  %s2015_s4 = inlined_call_operand.hbm [shape: bf16[1,32,32], index: 4, kind: input, shape index: {}]   ;;  %s2016_s5 = inlined_call_operand.hbm [shape: bf16[1,32,32], index: 5, kind: input, shape index: {}]   ;;  %s2017_s6 = inlined_call_operand.hbm [shape: f32[2,8,32], index: 6, kind: output, shape index: {}]  }
   0x1   :  { %2020 = sst [smem:[#allocation28_spill]] %s2013_s2 }
   0x2   :  { %2021 = sst [smem:[#allocation29_spill]] %s2014_s3 }
   0x3   :  { %2022 = sst [smem:[#allocation30_spill]] %s2015_s4 }
   0x4   :  { %2023 = sst [smem:[#allocation31_spill]] %s2016_s5 }
   0x5   :  { %11 = vsyncpa [#allocation8], 0 }
   0x6   :  { %13 = vsyncpa [#allocation8 + $0x1], 0 }
   0x7   :  { %14 = vsyncpa [#allocation11], 0 }
   0x8   :  { %16 = vsyncpa [#allocation11 + $0x1], 0 }
   0x9   :  { %17 = vsyncpa [#allocation14], 0 }
   0xa   :  { %18 = vsyncpa [#allocation17], 0 }
   0xb   :  { %19 = vsyncpa [#allocation9], 0 }
   0xc   :  { %21 = vsyncpa [#allocation9 + $0x1], 0  ;;  %s1722_s21 = smov 0   ;;  %s1724_s22 = smov 0  }
   0xd   :  { %s1726_s23 = smov 0   ;;  %s1728_s24 = smov 0  }
   0xe   :  { %s1730_s25 = smov 0   ;;  %s1732_s26 = smov 0  }
   0xf LB: > { %2024 = sst [smem:[#allocation25_spill]] %s1666_s25  ;;  %s1753_s27 = sadd.s32 4294967295, %s1670_s26   ;;  %s1670_s26 = sphi %s1732_s26, %s27_s26   ;;  %s1666_s25 = sphi %s1730_s25, %s2039_s25   ;;  %s1662_s24 = sphi %s1728_s24, %s2038_s24   ;;  %s1658_s23 = sphi %s1726_s23, %s2042_s23   ;;  %s1654_s22 = sphi %s1724_s22, %s2041_s22   ;;  %s1650_s21 = sphi %s1722_s21, %s2040_s21  }
  0x10   : > { %p1172_p0 = scmp.ge.s32.totalorder %s1670_s26, 1  ;;  %p76_p1 = scmp.eq.s32.totalorder %s1753_s27, 0 }
  0x11   : > { %p246_p2 = scmp.lt.s32.totalorder %s1670_s26, 3  ;;  %s2025_s2 = sld [smem:[#allocation28_spill]] }
  0x12   : > { %s1672_s8 = smov [#allocation12]   ;;  %p1177_p6 = scmp.ge.s32.totalorder %s1670_s26, 2 }
  0x13   : > { %p1761_p3 = pnand %p1172_p0, %p246_p2  ;;  %s262_s9 = sshll.u32 %s1672_s8, 4  ;;  %s263_s9 = int_to_ptr.vmem [resolvable:$true] %s262_s9 }
  0x14   : > { %s2028_s3 = sld [smem:[#allocation29_spill]]  ;;  %s1673_s14 = smov 64  }
  0x15   : > { %p1268_p4 = pneg %p1761_p3  ;;  %s1674_s15 = smov 4  }
  0x16   : > { %s1675_s16 = smov [#allocation13]   ;;  %s2029_s4 = sld [smem:[#allocation30_spill]] }
  0x17   : > { %s260_s30 = sshll.u32 %s2025_s2, 4  ;;  %p1769_p5 = pnand %p1268_p4, %p76_p1  ;;  %s261_s30 = int_to_ptr.hbm [resolvable:$true] %s260_s30 }
  0x18   : > { %s279_s17 = sshll.u32 %s1675_s16, 4  ;;  %s2030_s5 = sld [smem:[#allocation31_spill]]  ;;  %s280_s17 = int_to_ptr.vmem [resolvable:$true] %s279_s17 }
  0x19   : > { %1271 = dma.hbm_to_vmem [thread:$0]  (!%p1769_p5), %s261_s30, 256, %s263_s9, [#allocation11], %s1673_s14, %s1673_s14, %s1674_s15  }
  0x1a   : > { %s277_s13 = sshll.u32 %s2028_s3, 4  ;;  %s1676_s8 = smov [#allocation15]   ;;  %s278_s13 = int_to_ptr.hbm [resolvable:$true] %s277_s13 }
  0x1b   : > { %1274 = dma.hbm_to_vmem [thread:$0]  (!%p1769_p5), %s278_s13, 256, %s280_s17, [#allocation14], %s1673_s14, %s1673_s14, %s1674_s15  }
  0x1c   : > { %s294_s20 = sshll.u32 %s2029_s4, 4  ;;  %s296_s9 = sshll.u32 %s1676_s8, 4  ;;  %s295_s20 = int_to_ptr.hbm [resolvable:$true] %s294_s20  ;;  %s297_s9 = int_to_ptr.vmem [resolvable:$true] %s296_s9 }
  0x1d   : > { %1277 = dma.hbm_to_vmem [thread:$0]  (!%p1769_p5), %s295_s20, 256, %s297_s9, [#allocation14], %s1673_s14, %s1673_s14, %s1674_s15  }
  0x1e   : > { %s311_s30 = sshll.u32 %s2030_s5, 4  ;;  %s1677_s11 = smov [#allocation16]   ;;  %s312_s30 = int_to_ptr.hbm [resolvable:$true] %s311_s30 }
  0x1f   : > { %s313_s12 = sshll.u32 %s1677_s11, 4  ;;  %s1171_s13 = sadd.s32 4294967294, %s1670_s26   ;;  %s314_s12 = int_to_ptr.vmem [resolvable:$true] %s313_s12 }
  0x20   : > { %1280 = dma.hbm_to_vmem [thread:$0]  (!%p1769_p5), %s312_s30, 256, %s314_s12, [#allocation17], %s1673_s14, %s1673_s14, %s1674_s15  }
  0x21   : > { %s53_s16 = sadd.s32 1, %s1666_s25  ;;  %s62_s17 = sadd.s32 1, %s1658_s23 }
  0x22   : > { %p55_p7 = scmp.ge.s32.totalorder %s53_s16, 2  ;;  %p69_p8 = scmp.ne.s32.totalorder %s1658_s23, %s1654_s22 }
  0x23   : > { %p70_p9 = scmp.eq.s32.totalorder %s1670_s26, 0  ;;  %p75_p11 = scmp.ne.s32.totalorder %s1654_s22, %s1650_s21 }
  0x24   : > { %s2044_s16 = smov (%p55_p7, %s53_s16), 0  ;;  %p233_p12 = scmp.eq.s32.totalorder %s1753_s27, 1 }
  0x25   : > { %2031 = sst [smem:[#allocation26_spill]] %s2044_s16  ;;  %p1799_p10 = por %p70_p9, %p69_p8 }
  0x26   : > { %s57_s10 = ssub.s32 %s1666_s25, %s2044_s16  ;;  %p1810_p0 = por %p76_p1, %p75_p11 }
  0x27   : > { %p60_p13 = scmp.eq.s32.totalorder %s57_s10, 0  ;;  %p1814_p2 = por %p233_p12, %p69_p8 }
  0x28   : > { %p239_p4 = scmp.eq.s32.totalorder %s1171_s13, 1  ;;  %p1296_p7 = scmp.lt.s32.totalorder %s1670_s26, 2 }
  0x29   : > { %s1819_s19 = scalar_select %p60_p13, %s1658_s23, %s62_s17  }
  0x2a   : > { %p1821_p5 = por %p239_p4, %p75_p11  ;;  %s327_s28 = sand.u32 1, %s1658_s23  }
  0x2b   : > { %2035 = sst [smem:[#allocation27_spill]] %s1819_s19  ;;  %s1179_s29 = sshll.u32 %s1666_s25, 2 }
  0x2c   : > { %s1178_s30 = sshll.u32 %s327_s28, 2  ;;  %s336_s11 = scalar_lea.hbm %s2011_s0, %s1179_s29 }
  0x2d   : > { %s338_s12 = sshll.u32 %s336_s11, 4  ;;  %s331_s10 = scalar_lea.vmem [#allocation7], %s1178_s30  ;;  %s339_s12 = int_to_ptr.hbm [resolvable:$true] %s338_s12 }
  0x2e   : > { %s340_s2 = sshll.u32 %s331_s10, 4  ;;  %p1282_p8 = pnand %p1296_p7, %p1799_p10  ;;  %s341_s2 = int_to_ptr.vmem [resolvable:$true] %s340_s2 }
  0x2f   : > { %s356_s3 = scalar_lea.hbm %s2012_s1, %s1179_s29  ;;  %s347_s4 = sand.u32 1, %s1670_s26  }
  0x30   : > { %s328_s5 = scalar_lea.sflag [#allocation8], %s327_s28  ;;  %s358_s16 = sshll.u32 %s356_s3, 4  ;;  %s359_s16 = int_to_ptr.hbm [resolvable:$true] %s358_s16 }
  0x31   : > { %1284 = dma.hbm_to_vmem [thread:$0]  (!%p1282_p8), %s339_s12, 64, %s341_s2, %s328_s5  }
  0x32   : > { %s351_s25 = scalar_lea.vmem [#allocation10], %s1178_s30  ;;  %s348_s8 = scalar_lea.sflag [#allocation11], %s347_s4 }
  0x33   : > { %s360_s19 = sshll.u32 %s351_s25, 4  ;;  %369 = sbr.rel (%p1761_p3) target bundleno = 1160 (0x488), region = 44  ;;  %s361_s19 = int_to_ptr.vmem [resolvable:$true] %s360_s19 }
  0x34   : > { %1287 = dma.hbm_to_vmem [thread:$0]  (!%p1282_p8), %s359_s16, 64, %s361_s19, %s348_s8  }
  0x35   : > { %s1840_s18 = sand.u32 (!%p1761_p3), 1, %s1654_s22  }
  0x36   : > { %s1183_s29 = sshll.u32 (!%p1761_p3), %s1840_s18, 2  ;;  %s372_s9 = scalar_lea.sflag (!%p1761_p3), [#allocation8], %s1840_s18 }
  0x37   : > { %s375_s28 = scalar_lea.vmem (!%p1761_p3), [#allocation7], %s1183_s29 }
  0x38   : > { %1625 = dma.done.wait (%p1810_p0), %s372_s9, 64  }
  0x39   : > { %1627 = vsyncadd (%p1810_p0), %s372_s9, 4294967232  ;;  %s381_s2 = sand.u32 1, %s1753_s27   ;;  %s385_s4 = scalar_lea.vmem [#allocation10], %s1183_s29 }
  0x3a   : > { %s382_s3 = scalar_lea.sflag [#allocation11], %s381_s2 }
  0x3b   : > { %1629 = dma.done.wait (%p1810_p0), %s382_s3, 64  }
  0x3c   : > { %1631 = vsyncadd (%p1810_p0), %s382_s3, 4294967232 }
  0x3d   : > { %1633 = dma.done.wait (%p76_p1), [#allocation11], 256  }
  0x3e   : > { %1635 = vsyncadd (%p76_p1), [#allocation11], 4294967040 }
  0x3f   : > { %1637 = dma.done.wait (%p76_p1), [#allocation14], 512  }
  0x40   : > { %1639 = vsyncadd (%p76_p1), [#allocation14], 4294966784 }
  0x41   : > { %1641 = dma.done.wait (%p76_p1), [#allocation17], 256  }
  0x42   : > { %1643 = vsyncadd (%p76_p1), [#allocation17], 4294967040  ;;  %vm447_vm0 = vcmask 261120   ;;  %v1678_v0 = vmov 0.0   ;;  %v1239_v1 = vld [vmem:[#allocation12 + $0x8] sm:$0xff]  ;;  %v1241_v2 = vld [vmem:[#allocation13 + $0x8] sm:$0xff] }
  0x43   : > { %498 = vst.msk [vmem:[#allocation4] sm:$0xff] %vm447_vm0, %v1678_v0  ;;  %479 = vmatpush.bf16.msra.mxu0 %v1239_v1  ;;  %526 = vmatpush.bf16.msra.mxu1 %v1241_v2  ;;  %v1238_v3 = vld [vmem:[#allocation12] sm:$0xff]  ;;  %v1240_v4 = vld [vmem:[#allocation13] sm:$0xff]  ;;  %v499_v6 = vld [vmem:[%s385_s4] sm:$0xf]  ;;  %vm487_vm1 = vcmask 257024  }
  0x44   : > { %448 = vst.msk [vmem:[#allocation2] sm:$0xff] %vm447_vm0, %v1678_v0  ;;  %v452_v5 = vld [vmem:[%s375_s28] sm:$0xf]  ;;  %vm565_vm2 = vcmask 64512   ;;  %s1679_s5 = smov 104   ;;  %s1680_s25 = smov 112  }
  0x45   : > { %s1681_s27 = smov 120   ;;  %v1243_v26 = vld [vmem:[#allocation15 + $0x8] sm:$0xff]  ;;  %v1242_v27 = vld [vmem:[#allocation15] sm:$0xff]  ;;  %vm489_vm3 = vcmask 7168   ;;  %v1682_v40 = vmov -inf   ;;  %v1683_v41 = vmov 0  }
  0x46   : > { %556 = vmatpush.bf16.msra.mxu2 %v1243_v26  ;;  %490 = vst.msk [vmem:[#allocation5] sm:$0xff] %vm489_vm3, %v1682_v40  ;;  %1366 = vset.pattern.permute.xlu1 %v1683_v41  ;;  %vm613_vm4 = vcmask 1043456   ;;  %s1684_s7 = smov 16   ;;  %s1685_s16 = smov 8   ;;  %vm732_vm5 = vcmask 130112   ;;  %vm821_vm6 = vcmask 195712  }
  0x47   : > { %480 = vmatpush.bf16.msra.mxu0 %v1238_v3  ;;  %527 = vmatpush.bf16.msra.mxu1 %v1240_v4  ;;  %491 = vst.msk [vmem:[#allocation5 + $0x8] sm:$0xff] %vm489_vm3, %v1682_v40  ;;  %s1686_s14 = smov 24   ;;  %vm910_vm7 = vcmask 261312   ;;  %s1189_s19 = sshll.u32 %s1840_s18, 3 }
  0x48   : > { %492 = vst.msk [vmem:[#allocation5 + $0x10] sm:$0xff] %vm489_vm3, %v1682_v40  ;;  %1365 = vset.pattern.permute.xlu0 %v1683_v41  ;;  %1367 = vset.pattern.permute.xlu2 %v1683_v41  ;;  %s1235_s30 = sshll.u32 %s1662_s24, 3  ;;  %s439_s13 = scalar_lea.vmem [#allocation18], %s1189_s19 }
  0x49   : > { %493 = vst.msk [vmem:[#allocation5 + $0x18] sm:$0xff] %vm489_vm3, %v1682_v40  ;;  %s1009_s10 = scalar_lea.hbm %s2017_s6, %s1235_s30  ;;  %s1011_s17 = sshll.u32 %s439_s13, 4  ;;  %s1012_s17 = int_to_ptr.vmem [resolvable:$true] %s1011_s17 }
  0x4a   : > { %1198 = vmatmul.msk.bf16.vlgmr.msra.gmra.mxu0 %vm447_vm0, %v452_v5  ;;  %1207 = vmatmul.msk.bf16.vlgmr.msra.gmra.mxu1 %vm447_vm0, %v499_v6  ;;  %494 = vst.msk [vmem:[#allocation6] sm:$0xff] %vm489_vm3, %v1678_v0  ;;  %v630_v40 = vld [vmem:[#allocation4] sm:$0xff]  ;;  %s1013_s8 = sshll.u32 %s1009_s10, 4  ;;  %s998_s29 = scalar_lea.sflag [#allocation9], %s1840_s18  ;;  %s1014_s8 = int_to_ptr.hbm [resolvable:$true] %s1013_s8 }
  0x4b   : > { %557 = vmatpush.bf16.msra.mxu2 %v1242_v27  ;;  %495 = vst.msk [vmem:[#allocation6 + $0x8] sm:$0xff] %vm489_vm3, %v1678_v0  ;;  %s1586_s9 = sshra.s32 %s1014_s8, 4  ;;  %s1592_s3 = scalar_lea.hbm %s2017_s6, 16  ;;  %s1587_s9 = int_to_ptr.hbm [resolvable:$true] %s1586_s9 }
  0x4c   : > { %496 = vst.msk [vmem:[#allocation6 + $0x10] sm:$0xff] %vm489_vm3, %v1678_v0  ;;  %s1588_s24 = scalar_lea.hbm %s1587_s9, 8  ;;  %p1593_p10 = scmp.lt.s32.totalorder %s1587_s9, %s2017_s6 }
  0x4d   : > { %497 = vst.msk [vmem:[#allocation6 + $0x18] sm:$0xff] %vm489_vm3, %v1678_v0  ;;  %v585_v44 = vld [vmem:[#allocation5] sm:$0xff]  ;;  %p1589_p1 = scmp.ne.s32.totalorder %s1587_s9, %s1588_s24  ;;  %p1594_p11 = scmp.lt.s32.totalorder %s1592_s3, %s1588_s24 }
  0x4e   : > { %1216 = vmatmul.msk.bf16.vlgmr.msra.gmra.mxu2 %vm447_vm0, %v499_v6  ;;  %v671_v61 = vld [vmem:[#allocation5 + $0x8] sm:$0xff] }
  0x4f   : > { %v1915_v1 = vld [vmem:[#allocation5 + $0x10] sm:$0xff]  ;;  %p1590_p3 = pnand %p1589_p1, %p1814_p2  ;;  %p1595_p12 = por %p1594_p11, %p1593_p10 }
  0x51   : > { %p1591_p9 = pneg %p1590_p3 }
  0x53   : > { %p1596_p13 = pnand %p1595_p12, %p1591_p9 }
  0xc7   : > { %v482_v7 = vpop.f32.mrf.mxu0  ;;  %v529_v8 = vpop.f32.mrf.mxu1 }
  0xc8   : > { %v486_v9 = vpack.c.bf16 %v482_v7, %v482_v7  ;;  %v533_v10 = vpack.c.bf16 %v529_v8, %v529_v8 }
  0xca   : > { %488 = vst.msk [vmem:[#allocation3] sm:$0xf] %vm487_vm1, %v486_v9  ;;  %v647_v11 = vunpack.c.l.b16 %v533_v10  ;;  %v570_v12 = vsel %vm565_vm2, %v533_v10, 0  ;;  %v1925_v9 = vld [vmem:[#allocation5 + $0x18] sm:$0xff] }
  0xcb   : > { %579 = vmatpush.bf16.xpose.msra.mxu3 %v570_v12 }
  0xcc   : > { %v648_v13 = vpack.c.b16 %v647_v11, %v647_v11 }
  0xce   : > { %830 = vrot.lane.b32.xlu2 %v648_v13, %s1679_s5  ;;  %741 = vrot.lane.b32.xlu1 %v648_v13, %s1680_s25 }
  0xcf   : > { %649 = vrot.lane.b32.xlu0 %v648_v13, %s1681_s27  ;;  %v484_v14 = vpop.f32.mrf.mxu0  ;;  %v531_v15 = vpop.f32.mrf.mxu1 }
  0xd1   : > { %v564_v16 = vld [vmem:[#allocation3] sm:$0xf]  ;;  %v559_v55 = vpop.f32.mrf.mxu2 }
  0xd2   : > { %v824_v17 = vld [vmem:[#allocation3] sm:$0xf]  ;;  %1217 = vmatmul.msk.bf16.vlgmr.msra.gmra.mxu3 %vm565_vm2, %v564_v16  ;;  %v563_v56 = vpack.c.bf16 %v559_v55, %v559_v55  ;;  %v688_v55 = vld [vmem:[#allocation6 + $0x8] sm:$0xff] }
  0xd3   : > { %v735_v18 = vld [vmem:[#allocation3] sm:$0xf]  ;;  %v826_v19 = vunpack.c.l.b16 %v824_v17 }
  0xd4   : > { %v737_v20 = vunpack.c.l.b16 %v735_v18  ;;  %v640_v21 = vld [vmem:[#allocation3] sm:$0xf]  ;;  %v697_v57 = vunpack.c.l.b16 %v563_v56  ;;  %v615_v60 = vsel %vm613_vm4, %v563_v56, 0 }
  0xd5   : > { %v642_v22 = vunpack.c.l.b16 %v640_v21  ;;  %v827_v23 = vpack.c.b16 %v826_v19, %v826_v19  ;;  %624 = vmatpush.bf16.msrb.mxu0 %v615_v60  ;;  %v780_v60 = vld [vmem:[#allocation6 + $0x10] sm:$0xff] }
  0xd6   : > { %v738_v24 = vpack.c.b16 %v737_v20, %v737_v20  ;;  %v698_v58 = vpack.c.b16 %v697_v57, %v697_v57 }
  0xd7   : > { %v643_v25 = vpack.c.b16 %v642_v22, %v642_v22  ;;  %828 = vrot.lane.b32.xlu2 %v827_v23, %s1679_s5 }
  0xd8   : > { %739 = vrot.lane.b32.xlu1 %v738_v24, %s1680_s25 }
  0xd9   : > { %644 = vrot.lane.b32.xlu0 %v643_v25, %s1681_s27  ;;  %v561_v59 = vpop.f32.mrf.mxu2 }
 0x128   : > { %v831_v28 = vpop.permute.xlu2 %830 }
 0x129   : > { %v836_v33 = vsel %vm565_vm2, %v831_v28, 0 }
 0x131   : > { %v829_v38 = vpop.permute.xlu2 %828 }
 0x140   : > { %v742_v29 = vpop.permute.xlu1 %741 }
 0x141   : > { %v650_v30 = vpop.permute.xlu0 %649  ;;  %v747_v31 = vsel %vm565_vm2, %v742_v29, 0 }
 0x142   : > { %v655_v32 = vsel %vm565_vm2, %v650_v30, 0  ;;  %756 = vmatpush.bf16.xpose.msrb.mxu3 %v747_v31 }
 0x143   : > { %664 = vmatpush.bf16.xpose.msrb.mxu1 %v655_v32 }
 0x14a   : > { %v740_v34 = vpop.permute.xlu1 %739 }
 0x14b   : > { %845 = vmatpush.bf16.xpose.msra.mxu1 %v836_v33  ;;  %v645_v35 = vpop.permute.xlu0 %644  ;;  %1221 = vmatmul.msk.bf16.vlgmr.msrb.gmra.mxu3 %vm565_vm2, %v740_v34 }
 0x14c   : > { %1219 = vmatmul.msk.bf16.vlgmr.msrb.gmra.mxu1 %vm565_vm2, %v645_v35 }
 0x155   : > { %v581_v36 = vpop.f32.mrf.mxu3 }
 0x156   : > { %v586_v37 = vsel %vm565_vm2, %v581_v36, -inf }
 0x157   : > { %587 = vmax.xlane.f32.xlu1 %v586_v37 }
 0x15c   : > { %1223 = vmatmul.msk.bf16.vlgmr.msra.gmra.mxu1 %vm565_vm2, %v829_v38 }
 0x15d   : > { %v583_v39 = vpop.f32.mrf.mxu3 }
 0x1c9   : > { %v1899_v42 = vpop.f32.mrf.mxu1 }
 0x1ca   : > { %v672_v43 = vsel %vm565_vm2, %v1899_v42, -inf  ;;  %v588_v45 = vpop.xlane.xlu1 %587 }
 0x1cb   : > { %673 = vmax.xlane.f32.xlu0 %v672_v43  ;;  %v589_v46 = vmax.f32 %v585_v44, %v588_v45 }
 0x1cd   : > { %v590_v48 = vsub.f32 %v585_v44, %v589_v46  ;;  %639 = vst.msk [vmem:[#allocation5] sm:$0xff] %vm489_vm3, %v589_v46  ;;  %595 = vperm.xlu1 %1366, %v589_v46  }
 0x1ce   : > { %v1903_v47 = vpop.f32.mrf.mxu3 }
 0x1cf   : > { %v764_v49 = vsel %vm565_vm2, %v1903_v47, -inf  ;;  %v591_v7 = vmul.f32 1.442695, %v590_v48 }
 0x1d0   : > { %765 = vmax.xlane.f32.xlu2 %v764_v49  ;;  %v601_v49 = vld [vmem:[#allocation6] sm:$0xff] }
 0x1d1   : > { %v668_v50 = vpop.f32.mrf.mxu1 }
 0x1d6   : > { %v760_v51 = vpop.f32.mrf.mxu3 }
 0x1d9   : > { %v1908_v52 = vpop.f32.mrf.mxu1 }
 0x1da   : > { %v853_v53 = vsel %vm565_vm2, %v1908_v52, -inf }
 0x1db   : > { %854 = vmax.xlane.f32.xlu2 %v853_v53 }
 0x1e1   : > { %v849_v54 = vpop.f32.mrf.mxu1 }
 0x1f3   : > { %699 = vrot.lane.b32.xlu2 %v698_v58, %s1681_s27 }
 0x23e   : > { %v674_v62 = vpop.xlane.xlu0 %673 }
 0x23f   : > { %v675_v63 = vmax.f32 %v671_v61, %v674_v62  ;;  %v596_v0 = vpop.permute.xlu1 %595 }
 0x240   : > { %v598_v2 = vsub.f32 %v581_v36, %v596_v0 }
 0x241   : > { %734 = vst.msk [vmem:[#allocation5 + $0x8] sm:$0xff] %vm489_vm3, %v675_v63  ;;  %681 = vperm.xlu0 %1365, %v675_v63   ;;  %v676_v16 = vsub.f32 %v671_v61, %v675_v63 }
 0x242   : > { %v599_v4 = vmul.f32 1.442695, %v598_v2 }
 0x243   : > { %v766_v3 = vpop.xlane.xlu2 %765  ;;  %v677_v17 = vmul.f32 1.442695, %v676_v16 }
 0x244   : > { %v1918_v5 = vmax.f32 %v1915_v1, %v766_v3  ;;  %1368 = vpow2.f32 %v599_v4 }
 0x245   : > { %1370 = vpow2.f32 %v591_v7 }
 0x246   : > { %v768_v6 = vsub.f32 %v1915_v1, %v1918_v5  ;;  %823 = vst.msk [vmem:[#allocation5 + $0x10] sm:$0xff] %vm489_vm3, %v1918_v5  ;;  %773 = vperm.xlu1 %1366, %v1918_v5   ;;  %1372 = vpow2.f32 %v677_v17  ;;  %v869_v1 = vld [vmem:[#allocation6 + $0x18] sm:$0xff] }
 0x248   : > { %v769_v50 = vmul.f32 1.442695, %v768_v6 }
 0x24a   : > { %v1369_v8 = vpop.eup %1368 }
 0x24b   : > { %v609_v10 = vpack.c.bf16 %v1369_v8, %v1369_v8  ;;  %v1371_v14 = vpop.eup %1370  ;;  %v603_v15 = vsel %vm565_vm2, %v1369_v8, 0.0 }
 0x24c   : > { %v1373_v18 = vpop.eup %1372  ;;  %v602_v51 = vmul.f32 %v1371_v14, %v601_v49 }
 0x24d   : > { %1218 = vmatmul.msk.bf16.vlgmr.msrb.gmra.mxu0 %vm565_vm2, %v609_v10  ;;  %v689_v57 = vmul.f32 %v1373_v18, %v688_v55 }
 0x24e   : > { %v855_v11 = vpop.xlane.xlu2 %854  ;;  %788 = vrot.lane.b32.xlu1 %v698_v58, %s1680_s25 }
 0x24f   : > { %v1929_v12 = vmax.f32 %v1925_v9, %v855_v11 }
 0x251   : > { %v857_v13 = vsub.f32 %v1925_v9, %v1929_v12  ;;  %912 = vst.msk [vmem:[#allocation5 + $0x18] sm:$0xff] %vm489_vm3, %v1929_v12  ;;  %862 = vperm.xlu2 %1367, %v1929_v12  }
 0x253   : > { %v858_v56 = vmul.f32 1.442695, %v857_v13 }
 0x256   : > { %633 = vperm.xlu1 %1366, %v1371_v14   ;;  %v700_v19 = vpop.permute.xlu2 %699 }
 0x257   : > { %v705_v20 = vsel %vm613_vm4, %v700_v19, 0 }
 0x258   : > { %714 = vmatpush.bf16.msrb.mxu2 %v705_v20 }
 0x259   : > { %877 = vrot.lane.b32.xlu2 %v698_v58, %s1679_s5 }
 0x26b   : > { %604 = vadd.xlane.f32.xlu0 %v603_v15 }
 0x27f   : > { %723 = vperm.xlu0 %1365, %v1373_v18  }
 0x2ab   : > { %v863_v21 = vpop.permute.xlu2 %862 }
 0x2ac   : > { %v865_v29 = vsub.f32 %v1908_v52, %v863_v21 }
 0x2ae   : > { %v866_v32 = vmul.f32 1.442695, %v865_v29 }
 0x2b3   : > { %v682_v22 = vpop.permute.xlu0 %681  ;;  %v878_v23 = vpop.permute.xlu2 %877 }
 0x2b4   : > { %v684_v24 = vsub.f32 %v1899_v42, %v682_v22  ;;  %v883_v25 = vsel %vm613_vm4, %v878_v23, 0 }
 0x2b5   : > { %892 = vmatpush.bf16.msra.mxu2 %v883_v25 }
 0x2b6   : > { %v685_v26 = vmul.f32 1.442695, %v684_v24 }
 0x2b8   : > { %1374 = vpow2.f32 %v685_v26  ;;  %v774_v27 = vpop.permute.xlu1 %773 }
 0x2b9   : > { %v776_v28 = vsub.f32 %v1903_v47, %v774_v27 }
 0x2bb   : > { %v777_v30 = vmul.f32 1.442695, %v776_v28 }
 0x2bd   : > { %1376 = vpow2.f32 %v777_v30 }
 0x2be   : > { %v1375_v31 = vpop.eup %1374  ;;  %1378 = vpow2.f32 %v866_v32 }
 0x2bf   : > { %v690_v33 = vsel %vm565_vm2, %v1375_v31, 0.0  ;;  %v695_v34 = vpack.c.bf16 %v1375_v31, %v1375_v31  ;;  %1380 = vpow2.f32 %v769_v50  ;;  %v956_v50 = vld [vmem:[#allocation2] sm:$0xff] }
 0x2c0   : > { %691 = vadd.xlane.f32.xlu2 %v690_v33  ;;  %v789_v35 = vpop.permute.xlu1 %788  ;;  %1382 = vpow2.f32 %v858_v56 }
 0x2c1   : > { %v794_v36 = vsel %vm613_vm4, %v789_v35, 0  ;;  %1220 = vmatmul.msk.bf16.vlgmr.msrb.gmra.mxu2 %vm565_vm2, %v695_v34 }
 0x2c2   : > { %803 = vmatpush.bf16.msra.mxu0 %v794_v36 }
 0x2c3   : > { %v1377_v37 = vpop.eup %1376 }
 0x2c4   : > { %v787_v38 = vpack.c.bf16 %v1377_v37, %v1377_v37  ;;  %v782_v39 = vsel %vm565_vm2, %v1377_v37, 0.0  ;;  %v1379_v42 = vpop.eup %1378  ;;  %v1245_v37 = vld [vmem:[#allocation16 + $0x8] sm:$0xff] }
 0x2c5   : > { %783 = vadd.xlane.f32.xlu1 %v782_v39  ;;  %v871_v45 = vsel %vm565_vm2, %v1379_v42, 0.0  ;;  %v876_v47 = vpack.c.bf16 %v1379_v42, %v1379_v42  ;;  %v1381_v54 = vpop.eup %1380  ;;  %984 = vmatpush.bf16.msra.mxu3 %v1245_v37 }
 0x2c6   : > { %1222 = vmatmul.msk.bf16.vlgmr.msra.gmra.mxu0 %vm565_vm2, %v787_v38  ;;  %v781_v61 = vmul.f32 %v1381_v54, %v780_v60  ;;  %v1383_v0 = vpop.eup %1382  ;;  %v1244_v38 = vld [vmem:[#allocation16] sm:$0xff] }
 0x2c7   : > { %v870_v2 = vmul.f32 %v1383_v0, %v869_v1 }
 0x2c8   : > { %v634_v41 = vpop.permute.xlu1 %633 }
 0x2c9   : > { %v636_v43 = vmul.f32 %v634_v41, %v630_v40  ;;  %985 = vmatpush.bf16.msra.mxu3 %v1244_v38 }
 0x2ca   : > { %v626_v44 = vpop.f32.mrf.mxu0 }
 0x2cb   : > { %v637_v46 = vadd.f32 %v636_v43, %v626_v44 }
 0x2cd   : > { %872 = vadd.xlane.f32.xlu1 %v871_v45  ;;  %638 = vst.msk [vmem:[#allocation4] sm:$0xff] %vm565_vm2, %v637_v46 }
 0x2d1   : > { %1224 = vmatmul.msk.bf16.vlgmr.msra.gmra.mxu2 %vm565_vm2, %v876_v47 }
 0x2d2   : > { %v628_v48 = vpop.f32.mrf.mxu0 }
 0x2d4   : > { %v720_v20 = vld [vmem:[#allocation4] sm:$0xff] }
 0x2de   : > { %v605_v52 = vpop.xlane.xlu0 %604 }
 0x2df   : > { %v606_v53 = vadd.f32 %v605_v52, %v602_v51 }
 0x2e1   : > { %608 = vst.msk [vmem:[#allocation6] sm:$0xff] %vm489_vm3, %v606_v53 }
 0x2e6   : > { %812 = vperm.xlu1 %1366, %v1381_v54  }
 0x2e8   : > { %v917_v9 = vld [vmem:[#allocation6] sm:$0xff] }
 0x2f1   : > { %v724_v19 = vpop.permute.xlu0 %723 }
 0x2f2   : > { %v726_v21 = vmul.f32 %v724_v19, %v720_v20 }
 0x333   : > { %v692_v58 = vpop.xlane.xlu2 %691 }
 0x334   : > { %v693_v59 = vadd.f32 %v692_v58, %v689_v57 }
 0x336   : > { %694 = vst.msk [vmem:[#allocation6 + $0x8] sm:$0xff] %vm489_vm3, %v693_v59 }
 0x338   : > { %v784_v62 = vpop.xlane.xlu1 %783 }
 0x339   : > { %v785_v63 = vadd.f32 %v784_v62, %v781_v61 }
 0x33b   : > { %786 = vst.msk [vmem:[#allocation6 + $0x10] sm:$0xff] %vm489_vm3, %v785_v63 }
 0x33d   : > { %v927_v14 = vld [vmem:[#allocation6 + $0x8] sm:$0xff] }
 0x340   : > { %v873_v3 = vpop.xlane.xlu1 %872 }
 0x341   : > { %v874_v4 = vadd.f32 %v873_v3, %v870_v2 }
 0x342   : > { %v937_v5 = vld [vmem:[#allocation6 + $0x10] sm:$0xff] }
 0x343   : > { %875 = vst.msk [vmem:[#allocation6 + $0x18] sm:$0xff] %vm489_vm3, %v874_v4  ;;  %v805_v6 = vpop.f32.mrf.mxu0  ;;  %1384 = vrcp.f32 %v937_v5 }
 0x344   : > { %v716_v7 = vpop.f32.mrf.mxu2  ;;  %817 = vrot.lane.b32.xlu0 %v805_v6, %s1684_s7  ;;  %1386 = vrcp.f32 %v917_v9 }
 0x345   : > { %728 = vrot.lane.b32.xlu2 %v716_v7, %s1685_s16 }
 0x349   : > { %v1385_v8 = vpop.eup %1384 }
 0x34a   : > { %941 = vperm.xlu1 %1366, %v1385_v8   ;;  %v947_v12 = vld [vmem:[#allocation6 + $0x18] sm:$0xff]  ;;  %v1387_v13 = vpop.eup %1386 }
 0x34b   : > { %v807_v10 = vpop.f32.mrf.mxu0  ;;  %1388 = vrcp.f32 %v947_v12 }
 0x34c   : > { %v718_v11 = vpop.f32.mrf.mxu2  ;;  %901 = vperm.xlu0 %1365, %v1383_v0   ;;  %1390 = vrcp.f32 %v927_v14 }
 0x351   : > { %v1389_v16 = vpop.eup %1388 }
 0x352   : > { %v1391_v17 = vpop.eup %1390 }
 0x354   : > { %v894_v15 = vpop.f32.mrf.mxu2  ;;  %921 = vperm.xlu0 %1365, %v1387_v13  }
 0x355   : > { %906 = vrot.lane.b32.xlu2 %v894_v15, %s1686_s14 }
 0x358   : > { %v813_v25 = vpop.permute.xlu1 %812 }
 0x35c   : > { %v896_v18 = vpop.f32.mrf.mxu2  ;;  %951 = vperm.xlu0 %1365, %v1389_v16  }
 0x35d   : > { %931 = vperm.xlu2 %1367, %v1391_v17  }
 0x39f   : > { %v729_v22 = vpop.permute.xlu2 %728 }
 0x3a0   : > { %v731_v23 = vadd.f32 %v729_v22, %v726_v21 }
 0x3a2   : > { %733 = vst.msk [vmem:[#allocation4] sm:$0xff] %vm732_vm5, %v731_v23 }
 0x3a9   : > { %v809_v24 = vld [vmem:[#allocation4] sm:$0xff] }
 0x3aa   : > { %v815_v26 = vmul.f32 %v813_v25, %v809_v24 }
 0x3af   : > { %v907_v32 = vpop.permute.xlu2 %906 }
 0x3b6   : > { %v818_v27 = vpop.permute.xlu0 %817 }
 0x3b7   : > { %v820_v28 = vadd.f32 %v818_v27, %v815_v26  ;;  %v932_v39 = vpop.permute.xlu2 %931 }
 0x3b9   : > { %822 = vst.msk [vmem:[#allocation4] sm:$0xff] %vm821_vm6, %v820_v28 }
 0x3bc   : > { %v942_v42 = vpop.permute.xlu1 %941 }
 0x3be   : > { %v902_v30 = vpop.permute.xlu0 %901 }
 0x3c0   : > { %v898_v29 = vld [vmem:[#allocation4] sm:$0xff] }
 0x3c1   : > { %v904_v31 = vmul.f32 %v902_v30, %v898_v29 }
 0x3c3   : > { %v909_v33 = vadd.f32 %v907_v32, %v904_v31 }
 0x3c5   : > { %911 = vst.msk [vmem:[#allocation4] sm:$0xff] %vm910_vm7, %v909_v33 }
 0x3c6   : > { %v922_v35 = vpop.permute.xlu0 %921 }
 0x3cc   : > { %v916_v34 = vld [vmem:[#allocation4] sm:$0xff] }
 0x3cd   : > { %v924_v36 = vmul.f32 %v922_v35, %v916_v34 }
 0x3ce   : > { %v952_v46 = vpop.permute.xlu0 %951 }
 0x3cf   : > { %925 = vst.msk [vmem:[#allocation4] sm:$0xff] %vm565_vm2, %v924_v36 }
 0x3d6   : > { %v926_v40 = vld [vmem:[#allocation4] sm:$0xff] }
 0x3d7   : > { %v934_v41 = vmul.f32 %v932_v39, %v926_v40 }
 0x3d9   : > { %935 = vst.msk [vmem:[#allocation4] sm:$0xff] %vm732_vm5, %v934_v41 }
 0x3e0   : > { %v936_v43 = vld [vmem:[#allocation4] sm:$0xff] }
 0x3e1   : > { %v944_v44 = vmul.f32 %v942_v42, %v936_v43 }
 0x3e3   : > { %945 = vst.msk [vmem:[#allocation4] sm:$0xff] %vm821_vm6, %v944_v44 }
 0x3ea   : > { %v946_v45 = vld [vmem:[#allocation4] sm:$0xff] }
 0x3eb   : > { %v954_v47 = vmul.f32 %v952_v46, %v946_v45 }
 0x3ed   : > { %955 = vst.msk [vmem:[#allocation4] sm:$0xff] %vm910_vm7, %v954_v47 }
 0x3f4   : > { %v957_v48 = vld [vmem:[#allocation4] sm:$0xff] }
 0x3f5   : > { %v958_v49 = vpack.c.bf16 %v957_v48, %v957_v48 }
 0x3f7   : > { %1233 = vmatmul.msk.bf16.vlgmr.msra.gmra.mxu3 %vm447_vm0, %v958_v49 }
 0x47a   : > { %v987_v51 = vpop.f32.mrf.mxu3 }
 0x47b   : > { %v991_v52 = vadd.f32 %v987_v51, %v956_v50 }
 0x47d   : > { %992 = vst.msk [vmem:[#allocation2] sm:$0xff] %vm447_vm0, %v991_v52 }
 0x482   : > { %v989_v53 = vpop.f32.mrf.mxu3 }
 0x484   : > { %v995_v54 = vld [vmem:[#allocation2] sm:$0xff] }
 0x485   : > { %996 = vst.msk [vmem:[%s439_s13] sm:$0xff] %vm447_vm0, %v995_v54 }
 0x486   : > { %1599 = shalt.err (!%p1596_p13)
}
 0x487   : > { %1266 = dma.vmem_to_hbm [thread:$0]  (%p1814_p2), %s1012_s17, 128, %s1014_s8, %s998_s29  }
 0x488 PF: > { %s1025_s18 = sand.u32 1, %s1650_s21   ;;  %p1289_p0 = pnand %p1177_p6, %p1821_p5 }
 0x489   : > { %s1026_s25 = scalar_lea.sflag [#allocation9], %s1025_s18 }
 0x48a   : > { %p1290_p4 = pneg %p1289_p0 }
 0x48c   : > { %1645 = dma.done.wait (%p1290_p4), %s1026_s25, 128  }
 0x48d   : > { %1647 = vsyncadd (%p1290_p4), %s1026_s25, 4294967168  ;;  %s27_s26 = sadd.s32 1, %s1670_s26   ;;  %s2037_s27 = sld [smem:[#allocation27_spill]] }
 0x48e   : > { %p24_p7 = scmp.ge.s32.totalorder %s27_s26, 4   ;;  %s2038_s24 = sld [smem:[#allocation25_spill]] }
 0x48f   : > { %s2039_s25 = sld [smem:[#allocation26_spill]]  ;;  %s2040_s21 = smov %s1654_s22 }
 0x490   : > { %s2041_s22 = smov %s1658_s23  ;;  %26 = sbr.rel (!%p24_p7) target bundleno = 15 (0xf), region = 144 }
 0x493   : > { %s2042_s23 = smov %s2037_s27 }
 0x495   :  { %1032 = vsyncpa [#allocation8], 1 }
 0x496   :  { %1034 = vsyncpa [#allocation8 + $0x1], 1 }
 0x497   :  { %1035 = vsyncpa [#allocation11], 1 }
 0x498   :  { %1037 = vsyncpa [#allocation11 + $0x1], 1 }
 0x499   :  { %1038 = vsyncpa [#allocation14], 1 }
 0x49a   :  { %1039 = vsyncpa [#allocation17], 1 }
 0x49b   :  { %1040 = vsyncpa [#allocation9], 1 }
 0x49c   :  { %1042 = vsyncpa [#allocation9 + $0x1], 1 }

</bundles_post_ra>
